<compile_context>
chip_gen: v7x
topology: tpu7x:2x2x1
jax: 0.10.0
libtpu: 0.0.40
codegen_flags: <defaults>
</compile_context>

<pallas_src>
import functools

import jax
import jax.numpy as jnp
from jax.experimental import pallas as pl
from jax.experimental.pallas import tpu as pltpu

LANE = 128


# --------------------------------------------------------------------------- #
# helpers
# --------------------------------------------------------------------------- #
def _round_up(x, m):
    return ((x + m - 1) // m) * m


def _pad2(x, shape, dtype):
    x = jnp.asarray(x)
    out = jnp.zeros(shape, dtype)
    return out.at[: x.shape[0], : x.shape[1]].set(x.astype(dtype))


def _vmem_budgets():
    """(tile_budget, vmem_limit ceiling) derived from physical per-core VMEM."""
    cap = 64 << 20                       # conservative fallback = v7x per-core
    try:
        info = pltpu.get_tpu_info()
        cap = int(getattr(info, "vmem_capacity_bytes", cap))
    except Exception:
        pass
    return int(cap * 0.60), int(cap * 0.85)


# --------------------------------------------------------------------------- #
# kernels
# --------------------------------------------------------------------------- #
def _s2_kernel(a_ref, s1_ref, norm_ref, b1_ref, s2_ref, acc_ref):
    """s2 = D^{-1/2} * relu(D^{-1/2} * (A @ s1) + b1), K-tiled over A columns."""
    k = pl.program_id(1)

    @pl.when(k == 0)
    def _():
        acc_ref[...] = jnp.zeros_like(acc_ref)

    acc_ref[...] += jnp.dot(a_ref[...], s1_ref[...],
                            preferred_element_type=jnp.float32)

    @pl.when(k == pl.num_programs(1) - 1)
    def _():
        norm = norm_ref[...]                                   # (tm, 1) f32
        h1 = jnp.maximum(norm * acc_ref[...] + b1_ref[...], 0.0)
        s2_ref[...] = (norm * h1).astype(s2_ref.dtype)


def _enc_kernel(a_ref, s2_ref, norm_ref, w2_ref, b2_ref, enc_ref, acc_ref):
    """enc = (D^{-1/2} (A @ s2)) @ W2 + b2, K-tiled over A columns."""
    k = pl.program_id(1)

    @pl.when(k == 0)
    def _():
        acc_ref[...] = jnp.zeros_like(acc_ref)

    acc_ref[...] += jnp.dot(a_ref[...], s2_ref[...],
                            preferred_element_type=jnp.float32)

    @pl.when(k == pl.num_programs(1) - 1)
    def _():
        agg = (norm_ref[...] * acc_ref[...]).astype(jnp.bfloat16)
        enc = jnp.dot(agg, w2_ref[...],
                      preferred_element_type=jnp.float32) + b2_ref[...]
        enc_ref[...] = enc.astype(enc_ref.dtype)


def _enc_proj_kernel(a_ref, s2_ref, norm_ref, w2_ref, b2_ref, w3_ref, w4_ref,
                     enc_ref, proj_ref, acc_ref):
    """Same as _enc_kernel plus proj = relu(enc @ W3) @ W4 in the finalize."""
    k = pl.program_id(1)

    @pl.when(k == 0)
    def _():
        acc_ref[...] = jnp.zeros_like(acc_ref)

    acc_ref[...] += jnp.dot(a_ref[...], s2_ref[...],
                            preferred_element_type=jnp.float32)

    @pl.when(k == pl.num_programs(1) - 1)
    def _():
        agg = (norm_ref[...] * acc_ref[...]).astype(jnp.bfloat16)
        enc = jnp.dot(agg, w2_ref[...],
                      preferred_element_type=jnp.float32) + b2_ref[...]
        enc_b = enc.astype(jnp.bfloat16)
        enc_ref[...] = enc_b.astype(enc_ref.dtype)
        p = jnp.maximum(jnp.dot(enc_b, w3_ref[...],
                                preferred_element_type=jnp.float32), 0.0)
        proj_ref[...] = jnp.dot(p.astype(jnp.bfloat16), w4_ref[...],
                                preferred_element_type=jnp.float32
                                ).astype(proj_ref.dtype)


def _adj_kernel(er_ref, ec_ref, adj_ref):
    """adj tile = sigmoid(enc_i @ enc_j^T) without materializing enc^T."""
    logits = jax.lax.dot_general(
        er_ref[...], ec_ref[...],
        dimension_numbers=(((1,), (1,)), ((), ())),
        preferred_element_type=jnp.float32)
    adj_ref[...] = jax.nn.sigmoid(logits).astype(adj_ref.dtype)


# --------------------------------------------------------------------------- #
# wrapper
# --------------------------------------------------------------------------- #
@functools.partial(jax.jit,
                   static_argnames=("need_proj", "adj_dtype", "proj_dtype"))
def gcae_forward(A, X, params, need_proj=False,
                 adj_dtype=jnp.bfloat16, proj_dtype=jnp.bfloat16):
    """GCAE forward. Returns sigmoid(enc enc^T) (and proj(enc) if need_proj).

    A must be a symmetric dense adjacency (0/1 or small-integer weights); rows
    with zero degree are normalized with degree 1.  adj/proj default to bf16 to
    halve the dominant HBM writeback; pass jnp.float32 if full precision stores
    are required downstream.
    """
    N, in_feat = X.shape
    w1, b1, w2, b2, w3, w4 = (params["w1"], params["b1"], params["w2"],
                              params["b2"], params["w3"], params["w4"])
    hid, latent = w1.shape[1], w2.shape[1]

    # Lane-dense padding of every matmul / store dimension.
    Np = _round_up(N, LANE)
    Fp = _round_up(in_feat, LANE)
    Hp = _round_up(hid, LANE)
    Lp = _round_up(latent, LANE)
    L2p = _round_up(2 * latent, LANE)

    # Norm vector computed ONCE, in f32, from the original A (exact degrees).
    deg = jnp.maximum(jnp.sum(A.astype(jnp.float32), axis=1, keepdims=True), 1.0)
    norm = jax.lax.rsqrt(deg)                                      # (N, 1)
    norm_p = jnp.ones((Np, 1), jnp.float32).at[:N, :].set(norm)

    a_p = _pad2(A, (Np, Np), jnp.bfloat16)       # bf16 MXU feed; halves A traffic
    b1_p = _pad2(b1, (1, Hp), jnp.float32)
    w2_p = _pad2(w2, (Hp, Lp), jnp.bfloat16)
    b2_p = _pad2(b2, (1, Lp), jnp.float32)
    w3_p = _pad2(w3, (Lp, L2p), jnp.bfloat16)
    w4_p = _pad2(w4, (L2p, Lp), jnp.bfloat16)

    # Old "pass 1" is tiny: s1 = D^{-1/2} (X @ W1), done with plain XLA.
    x_p = _pad2(X, (Np, Fp), jnp.float32)
    w1_p = _pad2(w1, (Fp, Hp), jnp.float32)
    s1 = (norm_p * jnp.dot(x_p, w1_p)).astype(jnp.bfloat16)        # (Np, Hp)

    # ---- generation-aware tile selection & VMEM limits ----------------------
    tile_budget, vmem_cap = _vmem_budgets()
    weights_bytes = (Hp * Lp + Lp * L2p + L2p * Lp) * 2 + (Hp + Lp) * 4

    def agg_pass_bytes(tm_, tk_):
        varying = tm_ * tk_ * 2 + tk_ * Hp * 2 + tm_ * 4     # A, s-tile, norm
        outs = tm_ * Hp * 2 + 2 * tm_ * Lp * 2               # worst case (pass 3)
        return 2 * varying + 2 * outs + tm_ * Hp * 4 + weights_bytes

    tm, tk = 128, 128
    found = False
    for cand_tm in (512, 256, 128):
        if found or Np % cand_tm:
            continue
        for cand_tk in (8192, 4096, 2048, 1024, 512, 256, 128):
            if Np % cand_tk:
                continue
            if agg_pass_bytes(cand_tm, cand_tk) <= tile_budget:
                tm, tk, found = cand_tm, cand_tk, True
                break

    adj_item = jnp.dtype(adj_dtype).itemsize
    ta = 128
    for cand in (2048, 1024, 512, 256, 128):
        if Np % cand:
            continue
        if 2 * (2 * cand * Lp * 2) + 2 * cand * cand * adj_item <= tile_budget:
            ta = cand
            break

    def vmem_limit(need):
        return min(max(int(need * 1.25) + (2 << 20), 32 << 20), vmem_cap)

    grid_rows, grid_k = Np // tm, Np // tk

    a_spec = pl.BlockSpec((tm, tk), lambda i, k: (i, k))
    s_spec = pl.BlockSpec((tk, Hp), lambda i, k: (k, 0))
    norm_spec = pl.BlockSpec((tm, 1), lambda i, k: (i, 0))
    row_out = lambda cols: pl.BlockSpec((tm, cols), lambda i, k: (i, 0))
    full = lambda shape: pl.BlockSpec(shape, lambda i, k: (0,) * len(shape))

    # --- pass 2: s2 = D^{-1/2} relu(D^{-1/2}(A @ s1) + b1) --------------------
    s2 = pl.pallas_call(
        _s2_kernel,
        out_shape=jax.ShapeDtypeStruct((Np, Hp), jnp.bfloat16),
        grid=(grid_rows, grid_k),
        in_specs=[a_spec, s_spec, norm_spec, full((1, Hp))],
        out_specs=row_out(Hp),
        scratch_shapes=[pltpu.VMEM((tm, Hp), jnp.float32)],
        compiler_params=pltpu.CompilerParams(
            dimension_semantics=("parallel", "arbitrary"),
            vmem_limit_bytes=vmem_limit(agg_pass_bytes(tm, tk))),
    )(a_p, s1, norm_p, b1_p)

    # --- pass 3: enc (bf16, fed to pass 4) [+ proj] ---------------------------
    if need_proj:
        enc_b, proj_p = pl.pallas_call(
            _enc_proj_kernel,
            out_shape=(jax.ShapeDtypeStruct((Np, Lp), jnp.bfloat16),
                       jax.ShapeDtypeStruct((Np, Lp), proj_dtype)),
            grid=(grid_rows, grid_k),
            in_specs=[a_spec, s_spec, norm_spec, full((Hp, Lp)), full((1, Lp)),
                      full((Lp, L2p)), full((L2p, Lp))],
            out_specs=(row_out(Lp), row_out(Lp)),
            scratch_shapes=[pltpu.VMEM((tm, Hp), jnp.float32)],
            compiler_params=pltpu.CompilerParams(
                dimension_semantics=("parallel", "arbitrary"),
                vmem_limit_bytes=vmem_limit(agg_pass_bytes(tm, tk))),
        )(a_p, s2, norm_p, w2_p, b2_p, w3_p, w4_p)
    else:
        enc_b = pl.pallas_call(
            _enc_kernel,
            out_shape=jax.ShapeDtypeStruct((Np, Lp), jnp.bfloat16),
            grid=(grid_rows, grid_k),
            in_specs=[a_spec, s_spec, norm_spec, full((Hp, Lp)), full((1, Lp))],
            out_specs=row_out(Lp),
            scratch_shapes=[pltpu.VMEM((tm, Hp), jnp.float32)],
            compiler_params=pltpu.CompilerParams(
                dimension_semantics=("parallel", "arbitrary"),
                vmem_limit_bytes=vmem_limit(agg_pass_bytes(tm, tk))),
        )(a_p, s2, norm_p, w2_p, b2_p)
        proj_p = None

    # --- pass 4: adj = sigmoid(enc enc^T), 2-D tiled, both axes parallel ------
    adj_need = 2 * (2 * ta * Lp * 2) + 2 * ta * ta * adj_item
    adj_p = pl.pallas_call(
        _adj_kernel,
        out_shape=jax.ShapeDtypeStruct((Np, Np), adj_dtype),
        grid=(Np // ta, Np // ta),
        in_specs=[pl.BlockSpec((ta, Lp), lambda i, j: (i, 0)),
                  pl.BlockSpec((ta, Lp), lambda i, j: (j, 0))],
        out_specs=pl.BlockSpec((ta, ta), lambda i, j: (i, j)),
        compiler_params=pltpu.CompilerParams(
            dimension_semantics=("parallel", "parallel"),
            vmem_limit_bytes=vmem_limit(adj_need)),
    )(enc_b, enc_b)

    adj = adj_p[:N, :N]
    if need_proj:
        return adj, proj_p[:N, :latent]
    return adj


# --------------------------------------------------------------------------- #
# parameter init + pure-JAX reference
# --------------------------------------------------------------------------- #
def init_params(key, in_feat, hid_size, latent_size):
    """Deterministic synthetic parameter init (shapes from GCAE.__init__)."""
    k1, k2, k3, k4, k5, k6 = jax.random.split(key, 6)
    scale = 0.1
    return {
        "w1": scale * jax.random.normal(k1, (in_feat, hid_size), jnp.float32),
        "b1": 0.05 * jax.random.normal(k5, (1, hid_size), jnp.float32),
        "w2": scale * jax.random.normal(k2, (hid_size, latent_size), jnp.float32),
        "b2": 0.05 * jax.random.normal(k6, (1, latent_size), jnp.float32),
        "w3": scale * jax.random.normal(k3, (latent_size, 2 * latent_size), jnp.float32),
        "w4": scale * jax.random.normal(k4, (2 * latent_size, latent_size), jnp.float32),
    }


def _reference(A, X, params):
    """Plain-JAX f32 reference for correctness checking."""
    deg = jnp.maximum(jnp.sum(A, axis=1, keepdims=True), 1.0)
    n = jax.lax.rsqrt(deg)
    a_hat = A * n * n.T
    h1 = jax.nn.relu(a_hat @ X @ params["w1"] + params["b1"])
    enc = a_hat @ h1 @ params["w2"] + params["b2"]
    adj = jax.nn.sigmoid(enc @ enc.T)
    proj = jax.nn.relu(enc @ params["w3"]) @ params["w4"]
    return adj, proj


if __name__ == "__main__":
    N, IN_FEAT, HID, LATENT = 16, 8, 32, 16

    key = jax.random.PRNGKey(0)
    k_a, k_x, k_p = jax.random.split(key, 3)

    # Random symmetric adjacency with self-loops (dense form of the DGLGraph).
    a_rand = (jax.random.uniform(k_a, (N, N)) < 0.3).astype(jnp.float32)
    A = jnp.clip(a_rand + a_rand.T + jnp.eye(N, dtype=jnp.float32), 0.0, 1.0)
    X = jax.random.normal(k_x, (N, IN_FEAT), jnp.float32)

    params = init_params(k_p, IN_FEAT, HID, LATENT)

    adj_recon, proj = gcae_forward(A, X, params, need_proj=True)
    jax.block_until_ready((adj_recon, proj))

    adj_ref, proj_ref = _reference(A, X, params)

    adj_f32 = adj_recon.astype(jnp.float32)
    proj_f32 = proj.astype(jnp.float32)

    assert adj_recon.shape == (N, N)
    assert proj.shape == (N, LATENT)
    assert bool(jnp.all(jnp.isfinite(adj_f32))) and bool(jnp.all(jnp.isfinite(proj_f32)))
    assert float(jnp.max(jnp.abs(adj_f32 - adj_ref))) < 5e-2
    assert float(jnp.max(jnp.abs(proj_f32 - proj_ref))) < 5e-2
    print("KERNEL_OK")
</pallas_src>

<mosaic_0001>
module attributes {stable_mosaic.version = 11 : i64} {
  func.func @_s2_kernel(%arg0: i32, %arg1: i32, %arg2: memref<128x128xbf16, #tpu.memory_space<vmem>>, %arg3: memref<128x128xbf16, #tpu.memory_space<vmem>>, %arg4: memref<128x1xf32, #tpu.memory_space<vmem>>, %arg5: memref<1x128xf32, #tpu.memory_space<vmem>>, %arg6: memref<128x128xbf16, #tpu.memory_space<vmem>>, %arg7: memref<128x128xf32, #tpu.memory_space<vmem>>) attributes {dimension_semantics = [#tpu.dimension_semantics<parallel>, #tpu.dimension_semantics<arbitrary>], iteration_bounds = array<i64: 1, 1>, scalar_prefetch = 0 : i64, scratch_operands = 1 : i64, tpu.core_type = #tpu.core_type<tc>, window_params = [{transform_indices = @transform_0, window_bounds = array<i64: 128, 128>}, {transform_indices = @transform_1, window_bounds = array<i64: 128, 128>}, {transform_indices = @transform_2, window_bounds = array<i64: 128, 1>}, {pipeline_mode = #tpu.pipeline_mode<synchronous>, transform_indices = @transform_3, window_bounds = array<i64: 1, 128>}, {transform_indices = @transform_4, window_bounds = array<i64: 128, 128>}]} {
    %c0_i32 = arith.constant 0 : i32
    %0 = arith.cmpi eq, %arg1, %c0_i32 : i32
    %1 = arith.extui %0 : i1 to i32
    %c0_i32_0 = arith.constant 0 : i32
    %2 = arith.cmpi ne, %1, %c0_i32_0 : i32
    scf.if %2 {
      %cst_10 = arith.constant 0.000000e+00 : f32
      %12 = vector.broadcast %cst_10 : f32 to vector<128x128xf32>
      %c0_11 = arith.constant 0 : index
      %c0_12 = arith.constant 0 : index
      %13 = vector.load %arg7[%c0_11, %c0_12] : memref<128x128xf32, #tpu.memory_space<vmem>>, vector<128x128xf32>
      tpu.vector_store %arg7[%c0_11, %c0_12], %12 {strides = array<i32>} : memref<128x128xf32, #tpu.memory_space<vmem>>, vector<128x128xf32>,
    } else {
    }
    %c0 = arith.constant 0 : index
    %c0_1 = arith.constant 0 : index
    %3 = vector.load %arg7[%c0, %c0_1] : memref<128x128xf32, #tpu.memory_space<vmem>>, vector<128x128xf32>
    %c0_2 = arith.constant 0 : index
    %c0_3 = arith.constant 0 : index
    %4 = vector.load %arg2[%c0_2, %c0_3] : memref<128x128xbf16, #tpu.memory_space<vmem>>, vector<128x128xbf16>
    %c0_4 = arith.constant 0 : index
    %c0_5 = arith.constant 0 : index
    %5 = vector.load %arg3[%c0_4, %c0_5] : memref<128x128xbf16, #tpu.memory_space<vmem>>, vector<128x128xbf16>
    %cst = arith.constant dense<0.000000e+00> : vector<128x128xf32>
    %6 = tpu.matmul %4, %5, %cst {dimension_numbers = #tpu.dot_dimension_numbers<[1], [0], [0], [1], [0, 0, 1, 1], [], []>} : vector<128x128xbf16>, vector<128x128xbf16>, vector<128x128xf32> -> vector<128x128xf32>
    %7 = arith.addf %3, %6 : vector<128x128xf32>
    %c0_6 = arith.constant 0 : index
    %c0_7 = arith.constant 0 : index
    %8 = vector.load %arg7[%c0_6, %c0_7] : memref<128x128xf32, #tpu.memory_space<vmem>>, vector<128x128xf32>
    tpu.vector_store %arg7[%c0_6, %c0_7], %7 {strides = array<i32>} : memref<128x128xf32, #tpu.memory_space<vmem>>, vector<128x128xf32>,
    %c0_i32_8 = arith.constant 0 : i32
    %9 = arith.cmpi eq, %arg1, %c0_i32_8 : i32
    %10 = arith.extui %9 : i1 to i32
    %c0_i32_9 = arith.constant 0 : i32
    %11 = arith.cmpi ne, %10, %c0_i32_9 : i32
    scf.if %11 {
      %c0_10 = arith.constant 0 : index
      %c0_11 = arith.constant 0 : index
      %12 = vector.load %arg4[%c0_10, %c0_11] : memref<128x1xf32, #tpu.memory_space<vmem>>, vector<128x1xf32>
      %c0_12 = arith.constant 0 : index
      %c0_13 = arith.constant 0 : index
      %13 = vector.load %arg7[%c0_12, %c0_13] : memref<128x128xf32, #tpu.memory_space<vmem>>, vector<128x128xf32>
      %14 = vector.broadcast %12 : vector<128x1xf32> to vector<128x128xf32>
      %15 = arith.mulf %14, %13 : vector<128x128xf32>
      %c0_14 = arith.constant 0 : index
      %c0_15 = arith.constant 0 : index
      %16 = vector.load %arg5[%c0_14, %c0_15] : memref<1x128xf32, #tpu.memory_space<vmem>>, vector<1x128xf32>
      %17 = vector.broadcast %16 : vector<1x128xf32> to vector<128x128xf32>
      %18 = arith.addf %15, %17 : vector<128x128xf32>
      %cst_16 = arith.constant 0.000000e+00 : f32
      %19 = vector.broadcast %cst_16 : f32 to vector<128x128xf32>
      %20 = arith.maximumf %18, %19 : vector<128x128xf32>
      %21 = vector.broadcast %12 : vector<128x1xf32> to vector<128x128xf32>
      %22 = arith.mulf %21, %20 : vector<128x128xf32>
      %23 = arith.truncf %22 : vector<128x128xf32> to vector<128x128xbf16>
      %c0_17 = arith.constant 0 : index
      %c0_18 = arith.constant 0 : index
      %24 = vector.load %arg6[%c0_17, %c0_18] : memref<128x128xbf16, #tpu.memory_space<vmem>>, vector<128x128xbf16>
      tpu.vector_store %arg6[%c0_17, %c0_18], %23 {strides = array<i32>} : memref<128x128xbf16, #tpu.memory_space<vmem>>, vector<128x128xbf16>,
    } else {
    }
    return
  }
  func.func @transform_0(%arg0: i32, %arg1: i32) -> (i32, i32) {
    %c0_i32 = arith.constant 0 : i32
    return %arg0, %arg1 : i32, i32
  }
  func.func @transform_1(%arg0: i32, %arg1: i32) -> (i32, i32) {
    %c0_i32 = arith.constant 0 : i32
    %c0_i32_0 = arith.constant 0 : i32
    return %arg1, %c0_i32 : i32, i32
  }
  func.func @transform_2(%arg0: i32, %arg1: i32) -> (i32, i32) {
    %c0_i32 = arith.constant 0 : i32
    %c0_i32_0 = arith.constant 0 : i32
    return %arg0, %c0_i32 : i32, i32
  }
  func.func @transform_3(%arg0: i32, %arg1: i32) -> (i32, i32) {
    %c0_i32 = arith.constant 0 : i32
    %c0_i32_0 = arith.constant 0 : i32
    %c0_i32_1 = arith.constant 0 : i32
    return %c0_i32, %c0_i32_0 : i32, i32
  }
  func.func @transform_4(%arg0: i32, %arg1: i32) -> (i32, i32) {
    %c0_i32 = arith.constant 0 : i32
    %c0_i32_0 = arith.constant 0 : i32
    return %arg0, %c0_i32 : i32, i32
  }
}

module attributes {stable_mosaic.version = 11 : i64} {
  func.func @_adj_kernel(%arg0: i32, %arg1: i32, %arg2: memref<128x128xbf16, #tpu.memory_space<vmem>>, %arg3: memref<128x128xbf16, #tpu.memory_space<vmem>>, %arg4: memref<128x128xbf16, #tpu.memory_space<vmem>>) attributes {dimension_semantics = [#tpu.dimension_semantics<parallel>, #tpu.dimension_semantics<parallel>], iteration_bounds = array<i64: 1, 1>, scalar_prefetch = 0 : i64, scratch_operands = 0 : i64, tpu.core_type = #tpu.core_type<tc>, window_params = [{transform_indices = @transform_0, window_bounds = array<i64: 128, 128>}, {transform_indices = @transform_1, window_bounds = array<i64: 128, 128>}, {transform_indices = @transform_2, window_bounds = array<i64: 128, 128>}]} {
    %c0 = arith.constant 0 : index
    %c0_0 = arith.constant 0 : index
    %0 = vector.load %arg2[%c0, %c0_0] : memref<128x128xbf16, #tpu.memory_space<vmem>>, vector<128x128xbf16>
    %c0_1 = arith.constant 0 : index
    %c0_2 = arith.constant 0 : index
    %1 = vector.load %arg3[%c0_1, %c0_2] : memref<128x128xbf16, #tpu.memory_space<vmem>>, vector<128x128xbf16>
    %cst = arith.constant dense<0.000000e+00> : vector<128x128xf32>
    %2 = tpu.matmul %0, %1, %cst {dimension_numbers = #tpu.dot_dimension_numbers<[1], [1], [0], [0], [0, 0, 1, 0], [], []>} : vector<128x128xbf16>, vector<128x128xbf16>, vector<128x128xf32> -> vector<128x128xf32>
    %3 = arith.negf %2 : vector<128x128xf32>
    %4 = math.exp %3 : vector<128x128xf32>
    %cst_3 = arith.constant 1.000000e+00 : f32
    %5 = vector.broadcast %cst_3 : f32 to vector<128x128xf32>
    %6 = arith.addf %5, %4 : vector<128x128xf32>
    %7 = arith.divf %5, %6 : vector<128x128xf32>
    %8 = arith.truncf %7 : vector<128x128xf32> to vector<128x128xbf16>
    %c0_4 = arith.constant 0 : index
    %c0_5 = arith.constant 0 : index
    %9 = vector.load %arg4[%c0_4, %c0_5] : memref<128x128xbf16, #tpu.memory_space<vmem>>, vector<128x128xbf16>
    tpu.vector_store %arg4[%c0_4, %c0_5], %8 {strides = array<i32>} : memref<128x128xbf16, #tpu.memory_space<vmem>>, vector<128x128xbf16>,
    return
  }
  func.func @transform_0(%arg0: i32, %arg1: i32) -> (i32, i32) {
    %c0_i32 = arith.constant 0 : i32
    %c0_i32_0 = arith.constant 0 : i32
    return %arg0, %c0_i32 : i32, i32
  }
  func.func @transform_1(%arg0: i32, %arg1: i32) -> (i32, i32) {
    %c0_i32 = arith.constant 0 : i32
    %c0_i32_0 = arith.constant 0 : i32
    return %arg1, %c0_i32 : i32, i32
  }
  func.func @transform_2(%arg0: i32, %arg1: i32) -> (i32, i32) {
    %c0_i32 = arith.constant 0 : i32
    return %arg0, %arg1 : i32, i32
  }
}

module attributes {stable_mosaic.version = 11 : i64} {
  func.func @_enc_proj_kernel(%arg0: i32, %arg1: i32, %arg2: memref<128x128xbf16, #tpu.memory_space<vmem>>, %arg3: memref<128x128xbf16, #tpu.memory_space<vmem>>, %arg4: memref<128x1xf32, #tpu.memory_space<vmem>>, %arg5: memref<128x128xbf16, #tpu.memory_space<vmem>>, %arg6: memref<1x128xf32, #tpu.memory_space<vmem>>, %arg7: memref<128x128xbf16, #tpu.memory_space<vmem>>, %arg8: memref<128x128xbf16, #tpu.memory_space<vmem>>, %arg9: memref<128x128xbf16, #tpu.memory_space<vmem>>, %arg10: memref<128x128xbf16, #tpu.memory_space<vmem>>, %arg11: memref<128x128xf32, #tpu.memory_space<vmem>>) attributes {dimension_semantics = [#tpu.dimension_semantics<parallel>, #tpu.dimension_semantics<arbitrary>], iteration_bounds = array<i64: 1, 1>, scalar_prefetch = 0 : i64, scratch_operands = 1 : i64, tpu.core_type = #tpu.core_type<tc>, window_params = [{transform_indices = @transform_0, window_bounds = array<i64: 128, 128>}, {transform_indices = @transform_1, window_bounds = array<i64: 128, 128>}, {transform_indices = @transform_2, window_bounds = array<i64: 128, 1>}, {pipeline_mode = #tpu.pipeline_mode<synchronous>, transform_indices = @transform_3, window_bounds = array<i64: 128, 128>}, {pipeline_mode = #tpu.pipeline_mode<synchronous>, transform_indices = @transform_4, window_bounds = array<i64: 1, 128>}, {pipeline_mode = #tpu.pipeline_mode<synchronous>, transform_indices = @transform_5, window_bounds = array<i64: 128, 128>}, {pipeline_mode = #tpu.pipeline_mode<synchronous>, transform_indices = @transform_6, window_bounds = array<i64: 128, 128>}, {transform_indices = @transform_7, window_bounds = array<i64: 128, 128>}, {transform_indices = @transform_8, window_bounds = array<i64: 128, 128>}]} {
    %c0_i32 = arith.constant 0 : i32
    %0 = arith.cmpi eq, %arg1, %c0_i32 : i32
    %1 = arith.extui %0 : i1 to i32
    %c0_i32_0 = arith.constant 0 : i32
    %2 = arith.cmpi ne, %1, %c0_i32_0 : i32
    scf.if %2 {
      %cst_10 = arith.constant 0.000000e+00 : f32
      %12 = vector.broadcast %cst_10 : f32 to vector<128x128xf32>
      %c0_11 = arith.constant 0 : index
      %c0_12 = arith.constant 0 : index
      %13 = vector.load %arg11[%c0_11, %c0_12] : memref<128x128xf32, #tpu.memory_space<vmem>>, vector<128x128xf32>
      tpu.vector_store %arg11[%c0_11, %c0_12], %12 {strides = array<i32>} : memref<128x128xf32, #tpu.memory_space<vmem>>, vector<128x128xf32>,
    } else {
    }
    %c0 = arith.constant 0 : index
    %c0_1 = arith.constant 0 : index
    %3 = vector.load %arg11[%c0, %c0_1] : memref<128x128xf32, #tpu.memory_space<vmem>>, vector<128x128xf32>
    %c0_2 = arith.constant 0 : index
    %c0_3 = arith.constant 0 : index
    %4 = vector.load %arg2[%c0_2, %c0_3] : memref<128x128xbf16, #tpu.memory_space<vmem>>, vector<128x128xbf16>
    %c0_4 = arith.constant 0 : index
    %c0_5 = arith.constant 0 : index
    %5 = vector.load %arg3[%c0_4, %c0_5] : memref<128x128xbf16, #tpu.memory_space<vmem>>, vector<128x128xbf16>
    %cst = arith.constant dense<0.000000e+00> : vector<128x128xf32>
    %6 = tpu.matmul %4, %5, %cst {dimension_numbers = #tpu.dot_dimension_numbers<[1], [0], [0], [1], [0, 0, 1, 1], [], []>} : vector<128x128xbf16>, vector<128x128xbf16>, vector<128x128xf32> -> vector<128x128xf32>
    %7 = arith.addf %3, %6 : vector<128x128xf32>
    %c0_6 = arith.constant 0 : index
    %c0_7 = arith.constant 0 : index
    %8 = vector.load %arg11[%c0_6, %c0_7] : memref<128x128xf32, #tpu.memory_space<vmem>>, vector<128x128xf32>
    tpu.vector_store %arg11[%c0_6, %c0_7], %7 {strides = array<i32>} : memref<128x128xf32, #tpu.memory_space<vmem>>, vector<128x128xf32>,
    %c0_i32_8 = arith.constant 0 : i32
    %9 = arith.cmpi eq, %arg1, %c0_i32_8 : i32
    %10 = arith.extui %9 : i1 to i32
    %c0_i32_9 = arith.constant 0 : i32
    %11 = arith.cmpi ne, %10, %c0_i32_9 : i32
    scf.if %11 {
      %c0_10 = arith.constant 0 : index
      %c0_11 = arith.constant 0 : index
      %12 = vector.load %arg4[%c0_10, %c0_11] : memref<128x1xf32, #tpu.memory_space<vmem>>, vector<128x1xf32>
      %c0_12 = arith.constant 0 : index
      %c0_13 = arith.constant 0 : index
      %13 = vector.load %arg11[%c0_12, %c0_13] : memref<128x128xf32, #tpu.memory_space<vmem>>, vector<128x128xf32>
      %14 = vector.broadcast %12 : vector<128x1xf32> to vector<128x128xf32>
      %15 = arith.mulf %14, %13 : vector<128x128xf32>
      %16 = arith.truncf %15 : vector<128x128xf32> to vector<128x128xbf16>
      %c0_14 = arith.constant 0 : index
      %c0_15 = arith.constant 0 : index
      %17 = vector.load %arg5[%c0_14, %c0_15] : memref<128x128xbf16, #tpu.memory_space<vmem>>, vector<128x128xbf16>
      %cst_16 = arith.constant dense<0.000000e+00> : vector<128x128xf32>
      %18 = tpu.matmul %16, %17, %cst_16 {dimension_numbers = #tpu.dot_dimension_numbers<[1], [0], [0], [1], [0, 0, 1, 1], [], []>} : vector<128x128xbf16>, vector<128x128xbf16>, vector<128x128xf32> -> vector<128x128xf32>
      %c0_17 = arith.constant 0 : index
      %c0_18 = arith.constant 0 : index
      %19 = vector.load %arg6[%c0_17, %c0_18] : memref<1x128xf32, #tpu.memory_space<vmem>>, vector<1x128xf32>
      %20 = vector.broadcast %19 : vector<1x128xf32> to vector<128x128xf32>
      %21 = arith.addf %18, %20 : vector<128x128xf32>
      %22 = arith.truncf %21 : vector<128x128xf32> to vector<128x128xbf16>
      %c0_19 = arith.constant 0 : index
      %c0_20 = arith.constant 0 : index
      %23 = vector.load %arg9[%c0_19, %c0_20] : memref<128x128xbf16, #tpu.memory_space<vmem>>, vector<128x128xbf16>
      tpu.vector_store %arg9[%c0_19, %c0_20], %22 {strides = array<i32>} : memref<128x128xbf16, #tpu.memory_space<vmem>>, vector<128x128xbf16>,
      %c0_21 = arith.constant 0 : index
      %c0_22 = arith.constant 0 : index
      %24 = vector.load %arg7[%c0_21, %c0_22] : memref<128x128xbf16, #tpu.memory_space<vmem>>, vector<128x128xbf16>
      %cst_23 = arith.constant dense<0.000000e+00> : vector<128x128xf32>
      %25 = tpu.matmul %22, %24, %cst_23 {dimension_numbers = #tpu.dot_dimension_numbers<[1], [0], [0], [1], [0, 0, 1, 1], [], []>} : vector<128x128xbf16>, vector<128x128xbf16>, vector<128x128xf32> -> vector<128x128xf32>
      %cst_24 = arith.constant 0.000000e+00 : f32
      %26 = vector.broadcast %cst_24 : f32 to vector<128x128xf32>
      %27 = arith.maximumf %25, %26 : vector<128x128xf32>
      %28 = arith.truncf %27 : vector<128x128xf32> to vector<128x128xbf16>
      %c0_25 = arith.constant 0 : index
      %c0_26 = arith.constant 0 : index
      %29 = vector.load %arg8[%c0_25, %c0_26] : memref<128x128xbf16, #tpu.memory_space<vmem>>, vector<128x128xbf16>
      %cst_27 = arith.constant dense<0.000000e+00> : vector<128x128xf32>
      %30 = tpu.matmul %28, %29, %cst_27 {dimension_numbers = #tpu.dot_dimension_numbers<[1], [0], [0], [1], [0, 0, 1, 1], [], []>} : vector<128x128xbf16>, vector<128x128xbf16>, vector<128x128xf32> -> vector<128x128xf32>
      %31 = arith.truncf %30 : vector<128x128xf32> to vector<128x128xbf16>
      %c0_28 = arith.constant 0 : index
      %c0_29 = arith.constant 0 : index
      %32 = vector.load %arg10[%c0_28, %c0_29] : memref<128x128xbf16, #tpu.memory_space<vmem>>, vector<128x128xbf16>
      tpu.vector_store %arg10[%c0_28, %c0_29], %31 {strides = array<i32>} : memref<128x128xbf16, #tpu.memory_space<vmem>>, vector<128x128xbf16>,
    } else {
    }
    return
  }
  func.func @transform_0(%arg0: i32, %arg1: i32) -> (i32, i32) {
    %c0_i32 = arith.constant 0 : i32
    return %arg0, %arg1 : i32, i32
  }
  func.func @transform_1(%arg0: i32, %arg1: i32) -> (i32, i32) {
    %c0_i32 = arith.constant 0 : i32
    %c0_i32_0 = arith.constant 0 : i32
    return %arg1, %c0_i32 : i32, i32
  }
  func.func @transform_2(%arg0: i32, %arg1: i32) -> (i32, i32) {
    %c0_i32 = arith.constant 0 : i32
    %c0_i32_0 = arith.constant 0 : i32
    return %arg0, %c0_i32 : i32, i32
  }
  func.func @transform_3(%arg0: i32, %arg1: i32) -> (i32, i32) {
    %c0_i32 = arith.constant 0 : i32
    %c0_i32_0 = arith.constant 0 : i32
    %c0_i32_1 = arith.constant 0 : i32
    return %c0_i32, %c0_i32_0 : i32, i32
  }
  func.func @transform_4(%arg0: i32, %arg1: i32) -> (i32, i32) {
    %c0_i32 = arith.constant 0 : i32
    %c0_i32_0 = arith.constant 0 : i32
    %c0_i32_1 = arith.constant 0 : i32
    return %c0_i32, %c0_i32_0 : i32, i32
  }
  func.func @transform_5(%arg0: i32, %arg1: i32) -> (i32, i32) {
    %c0_i32 = arith.constant 0 : i32
    %c0_i32_0 = arith.constant 0 : i32
    %c0_i32_1 = arith.constant 0 : i32
    return %c0_i32, %c0_i32_0 : i32, i32
  }
  func.func @transform_6(%arg0: i32, %arg1: i32) -> (i32, i32) {
    %c0_i32 = arith.constant 0 : i32
    %c0_i32_0 = arith.constant 0 : i32
    %c0_i32_1 = arith.constant 0 : i32
    return %c0_i32, %c0_i32_0 : i32, i32
  }
  func.func @transform_7(%arg0: i32, %arg1: i32) -> (i32, i32) {
    %c0_i32 = arith.constant 0 : i32
    %c0_i32_0 = arith.constant 0 : i32
    return %arg0, %c0_i32 : i32, i32
  }
  func.func @transform_8(%arg0: i32, %arg1: i32) -> (i32, i32) {
    %c0_i32 = arith.constant 0 : i32
    %c0_i32_0 = arith.constant 0 : i32
    return %arg0, %c0_i32 : i32, i32
  }
}

</mosaic_0001>

<bundles_post_ra>
// kernel: gcae_forward.5
= control target key start
LH: loop header
LB: loop body
LE: loop exit
PB: predicated region body
PF: predicated region fallthrough
CT: control target
= control target key end

     0   :  { %s759_s1 = inlined_call_operand.vmem [shape: bf16[128,128], index: 1, kind: input, shape index: {}, may-alias: {0,1}]   ;;  %s760_s0 = inlined_call_operand.vmem [shape: bf16[128,128], index: 0, kind: input, shape index: {}, may-alias: {0,1}]   ;;  %s761_s2 = inlined_call_operand.vmem [shape: bf16[128,128], index: 2, kind: output, shape index: {}]  }
   0x1   :  { %v592_v0 = vld [vmem:[%s759_s1] sm:$0xff]   ;;  %v593_v1 = vld [vmem:[%s759_s1 + $0x8] sm:$0xff]   ;;  %v594_v2 = vld [vmem:[%s759_s1 + $0x10] sm:$0xff]  }
   0x2   :  { %544 = vmatprep.subr.bf16.mxu0 %v592_v0  ;;  %576 = vmatprep.subr.bf16.mxu1 %v592_v0  ;;  %v600_v3 = vld [vmem:[%s760_s0] sm:$0xff]   ;;  %v595_v5 = vld [vmem:[%s759_s1 + $0x18] sm:$0xff]   ;;  %v597_v7 = vld [vmem:[%s759_s1 + $0x28] sm:$0xff]  }
   0x3   :  { %545 = vmatpush3.bf16.xpose.msra.mxu0 %v592_v0  ;;  %584 = vmatpush3.bf16.xpose.msra.mxu1 %v592_v0  ;;  %v601_v4 = vld [vmem:[%s760_s0 + $0x20] sm:$0xff]   ;;  %v598_v8 = vld [vmem:[%s759_s1 + $0x30] sm:$0xff]   ;;  %v599_v9 = vld [vmem:[%s759_s1 + $0x38] sm:$0xff]  }
   0x4   :  { %546 = vmatprep.subr.bf16.mxu0 %v593_v1  ;;  %577 = vmatprep.subr.bf16.mxu1 %v593_v1  ;;  %v596_v6 = vld [vmem:[%s759_s1 + $0x20] sm:$0xff]   ;;  %v602_v10 = vld [vmem:[%s760_s0 + $0x8] sm:$0xff]   ;;  %v604_v12 = vld [vmem:[%s760_s0 + $0x10] sm:$0xff]  }
   0x5   :  { %560 = vmatprep.mubr.bf16.mxu0 %v600_v3  ;;  %568 = vmatprep.mubr.bf16.mxu1 %v601_v4  ;;  %v603_v11 = vld [vmem:[%s760_s0 + $0x28] sm:$0xff]   ;;  %v605_v13 = vld [vmem:[%s760_s0 + $0x30] sm:$0xff]   ;;  %v606_v14 = vld [vmem:[%s760_s0 + $0x18] sm:$0xff]  }
   0x6   :  { %v607_v15 = vld [vmem:[%s760_s0 + $0x38] sm:$0xff]  }
   0xb   :  { %547 = vmatpush3.bf16.xpose.msra.mxu0 %v593_v1  ;;  %585 = vmatpush3.bf16.xpose.msra.mxu1 %v593_v1 }
   0xc   :  { %548 = vmatprep.subr.bf16.mxu0 %v594_v2  ;;  %578 = vmatprep.subr.bf16.mxu1 %v594_v2 }
  0x13   :  { %549 = vmatpush3.bf16.xpose.msra.mxu0 %v594_v2  ;;  %586 = vmatpush3.bf16.xpose.msra.mxu1 %v594_v2 }
  0x14   :  { %550 = vmatprep.subr.bf16.mxu0 %v595_v5  ;;  %579 = vmatprep.subr.bf16.mxu1 %v595_v5 }
  0x1b   :  { %551 = vmatpush3.bf16.xpose.msra.mxu0 %v595_v5  ;;  %587 = vmatpush3.bf16.xpose.msra.mxu1 %v595_v5 }
  0x1c   :  { %552 = vmatprep.subr.bf16.mxu0 %v596_v6  ;;  %580 = vmatprep.subr.bf16.mxu1 %v596_v6 }
  0x23   :  { %553 = vmatpush3.bf16.xpose.msra.mxu0 %v596_v6  ;;  %588 = vmatpush3.bf16.xpose.msra.mxu1 %v596_v6 }
  0x24   :  { %554 = vmatprep.subr.bf16.mxu0 %v597_v7  ;;  %581 = vmatprep.subr.bf16.mxu1 %v597_v7 }
  0x2b   :  { %555 = vmatpush3.bf16.xpose.msra.mxu0 %v597_v7  ;;  %589 = vmatpush3.bf16.xpose.msra.mxu1 %v597_v7 }
  0x2c   :  { %556 = vmatprep.subr.bf16.mxu0 %v598_v8  ;;  %582 = vmatprep.subr.bf16.mxu1 %v598_v8 }
  0x33   :  { %557 = vmatpush3.bf16.xpose.msra.mxu0 %v598_v8  ;;  %590 = vmatpush3.bf16.xpose.msra.mxu1 %v598_v8 }
  0x34   :  { %558 = vmatprep.subr.bf16.mxu0 %v599_v9  ;;  %583 = vmatprep.subr.bf16.mxu1 %v599_v9 }
  0x3b   :  { %559 = vmatpush3.bf16.xpose.msra.mxu0 %v599_v9  ;;  %591 = vmatpush3.bf16.xpose.msra.mxu1 %v599_v9 }
  0x42   :  { %561 = vmatmul.mubr.bf16.vlgmr.msra.gmra.mrb[0].mxu0 %v602_v10  ;;  %569 = vmatmul.mubr.bf16.vlgmr.msra.gmra.mrb[0].mxu1 %v603_v11 }
  0x43   :  { %564 = vmatprep.mubr.bf16.mxu0 %v604_v12  ;;  %572 = vmatprep.mubr.bf16.mxu1 %v605_v13 }
  0x4a   :  { %565 = vmatmul.mubr.bf16.gmra.mrb[4].mxu0 %v606_v14  ;;  %573 = vmatmul.mubr.bf16.gmra.mrb[4].mxu1 %v607_v15 }
 0x115   :  { %v562_v16 = vpop.f32.mrb[0].mxu0  ;;  %v570_v17 = vpop.f32.mrb[0].mxu1 }
 0x116   :  { %v435_v18 = vmul.f32 -1.442695, %v562_v16  ;;  %v443_v19 = vmul.f32 -1.442695, %v570_v17  ;;  %v174_v20 = vpop.f32.mrb[1].mxu0  ;;  %v206_v21 = vpop.f32.mrb[1].mxu1 }
 0x117   :  { %v433_v22 = vmul.f32 -1.442695, %v174_v20  ;;  %v441_v23 = vmul.f32 -1.442695, %v206_v21  ;;  %v563_v24 = vpop.f32.mrb[2].mxu0  ;;  %v571_v25 = vpop.f32.mrb[2].mxu1 }
 0x118   :  { %608 = vpow2.f32 %v435_v18  ;;  %v436_v26 = vmul.f32 -1.442695, %v563_v24  ;;  %v177_v27 = vpop.f32.mrb[3].mxu0  ;;  %v209_v28 = vpop.f32.mrb[3].mxu1  ;;  %v444_v29 = vmul.f32 -1.442695, %v571_v25 }
 0x119   :  { %610 = vpow2.f32 %v443_v19  ;;  %v434_v30 = vmul.f32 -1.442695, %v177_v27  ;;  %v442_v31 = vmul.f32 -1.442695, %v209_v28 }
 0x11a   :  { %612 = vpow2.f32 %v433_v22 }
 0x11b   :  { %614 = vpow2.f32 %v441_v23 }
 0x11c   :  { %616 = vpow2.f32 %v436_v26 }
 0x11d   :  { %618 = vpow2.f32 %v444_v29  ;;  %v566_v32 = vpop.f32.mrb[4].mxu0  ;;  %v574_v33 = vpop.f32.mrb[4].mxu1 }
 0x11e   :  { %620 = vpow2.f32 %v434_v30  ;;  %v439_v34 = vmul.f32 -1.442695, %v566_v32  ;;  %v447_v35 = vmul.f32 -1.442695, %v574_v33  ;;  %v190_v36 = vpop.f32.mrb[5].mxu0  ;;  %v222_v37 = vpop.f32.mrb[5].mxu1 }
 0x11f   :  { %622 = vpow2.f32 %v442_v31  ;;  %v437_v38 = vmul.f32 -1.442695, %v190_v36  ;;  %v567_v39 = vpop.f32.mrb[6].mxu0  ;;  %v575_v40 = vpop.f32.mrb[6].mxu1  ;;  %v445_v59 = vmul.f32 -1.442695, %v222_v37 }
 0x120   :  { %624 = vpow2.f32 %v439_v34  ;;  %v440_v41 = vmul.f32 -1.442695, %v567_v39  ;;  %v193_v42 = vpop.f32.mrb[7].mxu0  ;;  %v225_v43 = vpop.f32.mrb[7].mxu1  ;;  %v448_v2 = vmul.f32 -1.442695, %v575_v40 }
 0x121   :  { %626 = vpow2.f32 %v447_v35  ;;  %v438_v5 = vmul.f32 -1.442695, %v193_v42  ;;  %v446_v7 = vmul.f32 -1.442695, %v225_v43 }
 0x122   :  { %v609_v44 = vpop.eup %608  ;;  %628 = vpow2.f32 %v437_v38 }
 0x123   :  { %v611_v45 = vpop.eup %610  ;;  %v287_v46 = vadd.f32 1.0, %v609_v44  ;;  %630 = vpow2.f32 %v440_v41 }
 0x124   :  { %v613_v47 = vpop.eup %612  ;;  %v295_v48 = vadd.f32 1.0, %v611_v45 }
 0x125   :  { %v615_v49 = vpop.eup %614  ;;  %632 = vrcp.f32 %v287_v46  ;;  %v285_v50 = vadd.f32 1.0, %v613_v47 }
 0x126   :  { %v617_v51 = vpop.eup %616  ;;  %634 = vrcp.f32 %v295_v48  ;;  %v293_v52 = vadd.f32 1.0, %v615_v49 }
 0x127   :  { %v619_v53 = vpop.eup %618  ;;  %636 = vrcp.f32 %v285_v50  ;;  %v288_v54 = vadd.f32 1.0, %v617_v51 }
 0x128   :  { %v621_v55 = vpop.eup %620  ;;  %638 = vrcp.f32 %v293_v52  ;;  %v296_v56 = vadd.f32 1.0, %v619_v53 }
 0x129   :  { %v623_v57 = vpop.eup %622  ;;  %640 = vrcp.f32 %v288_v54  ;;  %v286_v58 = vadd.f32 1.0, %v621_v55 }
 0x12a   :  { %v625_v60 = vpop.eup %624  ;;  %642 = vrcp.f32 %v296_v56  ;;  %v294_v61 = vadd.f32 1.0, %v623_v57 }
 0x12b   :  { %644 = vrcp.f32 %v286_v58  ;;  %v627_v62 = vpop.eup %626  ;;  %v291_v63 = vadd.f32 1.0, %v625_v60 }
 0x12c   :  { %646 = vrcp.f32 %v294_v61  ;;  %v629_v0 = vpop.eup %628  ;;  %v299_v19 = vadd.f32 1.0, %v627_v62 }
 0x12d   :  { %648 = vpow2.f32 %v445_v59  ;;  %v631_v1 = vpop.eup %630  ;;  %v289_v20 = vadd.f32 1.0, %v629_v0 }
 0x12e   :  { %v292_v4 = vadd.f32 1.0, %v631_v1  ;;  %650 = vrcp.f32 %v291_v63 }
 0x12f   :  { %v633_v3 = vpop.eup %632 }
 0x130   :  { %v635_v6 = vpop.eup %634  ;;  %652 = vrcp.f32 %v292_v4 }
 0x131   :  { %v637_v8 = vpop.eup %636  ;;  %654 = vpow2.f32 %v448_v2 }
 0x132   :  { %v639_v9 = vpop.eup %638  ;;  %656 = vpow2.f32 %v438_v5 }
 0x133   :  { %v641_v10 = vpop.eup %640  ;;  %658 = vpow2.f32 %v446_v7 }
 0x134   :  { %v643_v11 = vpop.eup %642  ;;  %v489_v12 = vpack.c.bf16 %v641_v10, %v633_v3  ;;  %660 = vrcp.f32 %v299_v19 }
 0x135   :  { %v645_v13 = vpop.eup %644  ;;  %v509_v14 = vpack.c.bf16 %v643_v11, %v635_v6  ;;  %662 = vrcp.f32 %v289_v20 }
 0x136   :  { %v647_v15 = vpop.eup %646  ;;  %521 = vst [vmem:[%s761_s2 + $0x8] sm:$0xff] %v489_v12   ;;  %v484_v16 = vpack.c.bf16 %v645_v13, %v637_v8 }
 0x137   :  { %v649_v17 = vpop.eup %648  ;;  %525 = vst [vmem:[%s761_s2 + $0x28] sm:$0xff] %v509_v14   ;;  %v504_v18 = vpack.c.bf16 %v647_v15, %v639_v9 }
 0x138   :  { %485 = vst [vmem:[%s761_s2] sm:$0xff] %v484_v16   ;;  %v651_v21 = vpop.eup %650  ;;  %v297_v22 = vadd.f32 1.0, %v649_v17 }
 0x139   :  { %524 = vst [vmem:[%s761_s2 + $0x20] sm:$0xff] %v504_v18  }
 0x13a   :  { %v653_v23 = vpop.eup %652  ;;  %664 = vrcp.f32 %v297_v22 }
 0x13b   :  { %v655_v24 = vpop.eup %654  ;;  %v499_v25 = vpack.c.bf16 %v653_v23, %v651_v21 }
 0x13c   :  { %v657_v26 = vpop.eup %656  ;;  %v300_v27 = vadd.f32 1.0, %v655_v24 }
 0x13d   :  { %v659_v28 = vpop.eup %658  ;;  %523 = vst [vmem:[%s761_s2 + $0x18] sm:$0xff] %v499_v25   ;;  %v290_v29 = vadd.f32 1.0, %v657_v26 }
 0x13e   :  { %666 = vrcp.f32 %v300_v27  ;;  %v298_v30 = vadd.f32 1.0, %v659_v28  ;;  %v661_v31 = vpop.eup %660 }
 0x13f   :  { %668 = vrcp.f32 %v290_v29  ;;  %v663_v32 = vpop.eup %662 }
 0x140   :  { %670 = vrcp.f32 %v298_v30 }
 0x144   :  { %v665_v33 = vpop.eup %664 }
 0x148   :  { %v667_v34 = vpop.eup %666 }
 0x149   :  { %v669_v35 = vpop.eup %668  ;;  %v519_v36 = vpack.c.bf16 %v667_v34, %v661_v31 }
 0x14a   :  { %v671_v37 = vpop.eup %670  ;;  %v494_v38 = vpack.c.bf16 %v669_v35, %v663_v32 }
 0x14b   :  { %527 = vst [vmem:[%s761_s2 + $0x38] sm:$0xff] %v519_v36   ;;  %v514_v39 = vpack.c.bf16 %v671_v37, %v665_v33 }
 0x14c   :  { %522 = vst [vmem:[%s761_s2 + $0x10] sm:$0xff] %v494_v38  }
 0x14d   :  { %526 = vst [vmem:[%s761_s2 + $0x30] sm:$0xff] %v514_v39  }

// kernel: gcae_forward.3
= control target key start
LH: loop header
LB: loop body
LE: loop exit
PB: predicated region body
PF: predicated region fallthrough
CT: control target
= control target key end

     0   :  { %v760_v1 = vmov 0   ;;  %s951_s1 = inlined_call_operand.vmem [shape: bf16[128,128], index: 1, kind: input, shape index: {}]   ;;  %s952_s0 = inlined_call_operand.vmem [shape: bf16[128,128], index: 0, kind: input, shape index: {}]   ;;  %s953_s2 = inlined_call_operand.vmem [shape: f32[128,1], index: 2, kind: input, shape index: {}]   ;;  %s954_s3 = inlined_call_operand.vmem [shape: f32[1,128], index: 3, kind: input, shape index: {}]   ;;  %s955_s4 = inlined_call_operand.vmem [shape: bf16[128,128], index: 4, kind: output, shape index: {}]  }
   0x1   :  { %v744_v0 = vld [vmem:[%s951_s1] sm:$0xff]   ;;  %743 = vset.pattern.permute.xlu1 %v760_v1  ;;  %742 = vset.pattern.permute.xlu0 %v760_v1  ;;  %v745_v2 = vld [vmem:[%s951_s1 + $0x8] sm:$0xff]   ;;  %v746_v3 = vld [vmem:[%s951_s1 + $0x10] sm:$0xff]  }
   0x2   :  { %693 = vmatprep.subr.bf16.mxu0 %v744_v0  ;;  %725 = vmatprep.subr.bf16.mxu1 %v744_v0  ;;  %v747_v4 = vld [vmem:[%s951_s1 + $0x18] sm:$0xff]   ;;  %v752_v5 = vld [vmem:[%s952_s0] sm:$0xff]   ;;  %v749_v8 = vld [vmem:[%s951_s1 + $0x28] sm:$0xff]  }
   0x3   :  { %694 = vmatpush3.bf16.msra.mxu0 %v744_v0  ;;  %733 = vmatpush3.bf16.msra.mxu1 %v744_v0  ;;  %v753_v6 = vld [vmem:[%s952_s0 + $0x20] sm:$0xff]   ;;  %v316_v9 = vld [vmem:[%s953_s2 + $0x10] sm:$0xff]  ;;  %v317_v11 = vld [vmem:[%s953_s2 + $0x18] sm:$0xff] }
   0x4   :  { %695 = vmatprep.subr.bf16.mxu0 %v745_v2  ;;  %726 = vmatprep.subr.bf16.mxu1 %v745_v2  ;;  %v748_v7 = vld [vmem:[%s951_s1 + $0x20] sm:$0xff]   ;;  %v315_v12 = vld [vmem:[%s953_s2 + $0x8] sm:$0xff]  ;;  %v750_v13 = vld [vmem:[%s951_s1 + $0x30] sm:$0xff]  }
   0x5   :  { %709 = vmatprep.mubr.bf16.mxu0 %v752_v5  ;;  %717 = vmatprep.mubr.bf16.mxu1 %v753_v6  ;;  %v314_v10 = vld [vmem:[%s953_s2] sm:$0xff]  ;;  %v319_v14 = vld [vmem:[%s953_s2 + $0x28] sm:$0xff]  ;;  %v751_v16 = vld [vmem:[%s951_s1 + $0x38] sm:$0xff]  }
   0x6   :  { %358 = vperm.xlu1 %743, %v316_v9   ;;  %348 = vperm.xlu0 %742, %v314_v10   ;;  %v318_v15 = vld [vmem:[%s953_s2 + $0x20] sm:$0xff]  ;;  %v321_v17 = vld [vmem:[%s953_s2 + $0x38] sm:$0xff]  ;;  %v320_v18 = vld [vmem:[%s953_s2 + $0x30] sm:$0xff] }
   0x7   :  { %696 = vmatpush3.bf16.msra.mxu0 %v745_v2  ;;  %734 = vmatpush3.bf16.msra.mxu1 %v745_v2  ;;  %v754_v19 = vld [vmem:[%s952_s0 + $0x8] sm:$0xff]   ;;  %v322_v22 = vld [vmem:[%s953_s2 + $0x40] sm:$0xff]  ;;  %v756_v23 = vld [vmem:[%s952_s0 + $0x10] sm:$0xff]  }
   0x8   :  { %697 = vmatprep.subr.bf16.mxu0 %v746_v3  ;;  %727 = vmatprep.subr.bf16.mxu1 %v746_v3  ;;  %v755_v20 = vld [vmem:[%s952_s0 + $0x28] sm:$0xff]   ;;  %v757_v24 = vld [vmem:[%s952_s0 + $0x30] sm:$0xff]   ;;  %v325_v25 = vld [vmem:[%s953_s2 + $0x58] sm:$0xff] }
   0x9   :  { %v323_v21 = vld [vmem:[%s953_s2 + $0x48] sm:$0xff]  ;;  %v324_v26 = vld [vmem:[%s953_s2 + $0x50] sm:$0xff]  ;;  %v758_v27 = vld [vmem:[%s952_s0 + $0x18] sm:$0xff]  }
   0xa   :  { %363 = vperm.xlu1 %743, %v317_v11   ;;  %353 = vperm.xlu0 %742, %v315_v12   ;;  %v759_v28 = vld [vmem:[%s952_s0 + $0x38] sm:$0xff]   ;;  %v327_v29 = vld [vmem:[%s953_s2 + $0x68] sm:$0xff]  ;;  %v326_v30 = vld [vmem:[%s953_s2 + $0x60] sm:$0xff] }
   0xb   :  { %698 = vmatpush3.bf16.msra.mxu0 %v746_v3  ;;  %735 = vmatpush3.bf16.msra.mxu1 %v746_v3  ;;  %v329_v31 = vld [vmem:[%s953_s2 + $0x78] sm:$0xff]  ;;  %v328_v32 = vld [vmem:[%s953_s2 + $0x70] sm:$0xff]  ;;  %v895_v47 = vld [vmem:[%s954_s3] ss:$0 sm:$0xff] }
   0xc   :  { %699 = vmatprep.subr.bf16.mxu0 %v747_v4  ;;  %728 = vmatprep.subr.bf16.mxu1 %v747_v4 }
   0xe   :  { %373 = vperm.xlu1 %743, %v319_v14   ;;  %368 = vperm.xlu0 %742, %v318_v15  }
   0xf   :  { %700 = vmatpush3.bf16.msra.mxu0 %v747_v4  ;;  %736 = vmatpush3.bf16.msra.mxu1 %v747_v4 }
  0x10   :  { %701 = vmatprep.subr.bf16.mxu0 %v748_v7  ;;  %729 = vmatprep.subr.bf16.mxu1 %v748_v7 }
  0x12   :  { %383 = vperm.xlu1 %743, %v321_v17   ;;  %378 = vperm.xlu0 %742, %v320_v18  }
  0x13   :  { %702 = vmatpush3.bf16.msra.mxu0 %v748_v7  ;;  %737 = vmatpush3.bf16.msra.mxu1 %v748_v7 }
  0x14   :  { %703 = vmatprep.subr.bf16.mxu0 %v749_v8  ;;  %730 = vmatprep.subr.bf16.mxu1 %v749_v8 }
  0x16   :  { %393 = vperm.xlu1 %743, %v323_v21   ;;  %388 = vperm.xlu0 %742, %v322_v22  }
  0x17   :  { %704 = vmatpush3.bf16.msra.mxu0 %v749_v8  ;;  %738 = vmatpush3.bf16.msra.mxu1 %v749_v8 }
  0x18   :  { %705 = vmatprep.subr.bf16.mxu0 %v750_v13  ;;  %731 = vmatprep.subr.bf16.mxu1 %v750_v13 }
  0x1a   :  { %403 = vperm.xlu1 %743, %v325_v25   ;;  %398 = vperm.xlu0 %742, %v324_v26  }
  0x1b   :  { %706 = vmatpush3.bf16.msra.mxu0 %v750_v13  ;;  %739 = vmatpush3.bf16.msra.mxu1 %v750_v13 }
  0x1c   :  { %707 = vmatprep.subr.bf16.mxu0 %v751_v16  ;;  %732 = vmatprep.subr.bf16.mxu1 %v751_v16 }
  0x1e   :  { %413 = vperm.xlu1 %743, %v327_v29   ;;  %408 = vperm.xlu0 %742, %v326_v30  }
  0x1f   :  { %708 = vmatpush3.bf16.msra.mxu0 %v751_v16  ;;  %740 = vmatpush3.bf16.msra.mxu1 %v751_v16 }
  0x22   :  { %710 = vmatmul.mubr.bf16.vlgmr.msra.gmra.mrb[0].mxu0 %v754_v19  ;;  %718 = vmatmul.mubr.bf16.vlgmr.msra.gmra.mrb[0].mxu1 %v755_v20 }
  0x23   :  { %713 = vmatprep.mubr.bf16.mxu0 %v756_v23  ;;  %721 = vmatprep.mubr.bf16.mxu1 %v757_v24 }
  0x24   :  { %423 = vperm.xlu1 %743, %v329_v31   ;;  %418 = vperm.xlu0 %742, %v328_v32  }
  0x2a   :  { %714 = vmatmul.mubr.bf16.gmra.mrb[4].mxu0 %v758_v27  ;;  %722 = vmatmul.mubr.bf16.gmra.mrb[4].mxu1 %v759_v28 }
  0x85   :  { %v349_v33 = vpop.permute.xlu0 %348  ;;  %v359_v34 = vpop.permute.xlu1 %358 }
  0x89   :  { %v354_v35 = vpop.permute.xlu0 %353  ;;  %v364_v36 = vpop.permute.xlu1 %363 }
  0x8d   :  { %v882_v37 = vpop.permute.xlu0 %368  ;;  %v884_v38 = vpop.permute.xlu1 %373 }
  0x91   :  { %v886_v39 = vpop.permute.xlu0 %378  ;;  %v888_v40 = vpop.permute.xlu1 %383 }
  0x95   :  { %v389_v41 = vpop.permute.xlu0 %388  ;;  %v394_v42 = vpop.permute.xlu1 %393 }
  0x99   :  { %v399_v43 = vpop.permute.xlu0 %398  ;;  %v404_v44 = vpop.permute.xlu1 %403 }
  0x9d   :  { %v890_v45 = vpop.permute.xlu0 %408  ;;  %v903_v7 = vpop.permute.xlu1 %413 }
  0xa3   :  { %v419_v12 = vpop.permute.xlu0 %418 }
  0xf5   :  { %v711_v46 = vpop.f32.mrb[0].mxu0  ;;  %v719_v48 = vpop.f32.mrb[0].mxu1 }
  0xf6   :  { %v428_v49 = vmul.f32 %v711_v46, %v359_v34  ;;  %v436_v50 = vmul.f32 %v719_v48, %v399_v43  ;;  %v216_v51 = vpop.f32.mrb[1].mxu0  ;;  %v248_v52 = vpop.f32.mrb[1].mxu1 }
  0xf7   :  { %v426_v53 = vmul.f32 %v349_v33, %v216_v51  ;;  %v434_v54 = vmul.f32 %v389_v41, %v248_v52  ;;  %v712_v55 = vpop.f32.mrb[2].mxu0  ;;  %v720_v56 = vpop.f32.mrb[2].mxu1 }
  0xf8   :  { %v451_v57 = vadd.f32 %v895_v47, %v428_v49  ;;  %v459_v58 = vadd.f32 %v895_v47, %v436_v50  ;;  %v429_v59 = vmul.f32 %v712_v55, %v364_v36  ;;  %v437_v60 = vmul.f32 %v720_v56, %v404_v44  ;;  %v219_v61 = vpop.f32.mrb[3].mxu0  ;;  %v251_v62 = vpop.f32.mrb[3].mxu1 }
  0xf9   :  { %v449_v63 = vadd.f32 %v895_v47, %v426_v53  ;;  %v457_v0 = vadd.f32 %v895_v47, %v434_v54  ;;  %v427_v1 = vmul.f32 %v354_v35, %v219_v61  ;;  %v435_v2 = vmul.f32 %v394_v42, %v251_v62  ;;  %v424_v49 = vpop.permute.xlu1 %423 }
  0xfa   :  { %v467_v3 = vmax.f32 %v451_v57, 0.0  ;;  %v475_v4 = vmax.f32 %v459_v58, 0.0  ;;  %v452_v5 = vadd.f32 %v895_v47, %v429_v59  ;;  %v460_v6 = vadd.f32 %v895_v47, %v437_v60 }
  0xfb   :  { %v465_v8 = vmax.f32 %v449_v63, 0.0  ;;  %v473_v9 = vmax.f32 %v457_v0, 0.0  ;;  %v450_v10 = vadd.f32 %v895_v47, %v427_v1  ;;  %v458_v11 = vadd.f32 %v895_v47, %v435_v2 }
  0xfc   :  { %v483_v13 = vmul.f32 %v467_v3, %v359_v34  ;;  %v491_v14 = vmul.f32 %v475_v4, %v399_v43  ;;  %v468_v15 = vmax.f32 %v452_v5, 0.0  ;;  %v476_v16 = vmax.f32 %v460_v6, 0.0 }
  0xfd   :  { %v481_v17 = vmul.f32 %v465_v8, %v349_v33  ;;  %v489_v18 = vmul.f32 %v473_v9, %v389_v41  ;;  %v466_v19 = vmax.f32 %v450_v10, 0.0  ;;  %v474_v20 = vmax.f32 %v458_v11, 0.0  ;;  %v715_v21 = vpop.f32.mrb[4].mxu0  ;;  %v723_v22 = vpop.f32.mrb[4].mxu1 }
  0xfe   :  { %v484_v23 = vmul.f32 %v468_v15, %v364_v36  ;;  %v492_v24 = vmul.f32 %v476_v16, %v404_v44  ;;  %v432_v25 = vmul.f32 %v715_v21, %v886_v39  ;;  %v440_v26 = vmul.f32 %v723_v22, %v419_v12  ;;  %v232_v27 = vpop.f32.mrb[5].mxu0  ;;  %v264_v28 = vpop.f32.mrb[5].mxu1 }
  0xff   :  { %v482_v29 = vmul.f32 %v466_v19, %v354_v35  ;;  %v490_v30 = vmul.f32 %v474_v20, %v394_v42  ;;  %v430_v31 = vmul.f32 %v882_v37, %v232_v27  ;;  %v438_v32 = vmul.f32 %v890_v45, %v264_v28  ;;  %v716_v34 = vpop.f32.mrb[6].mxu0  ;;  %v724_v33 = vpop.f32.mrb[6].mxu1 }
 0x100   :  { %v638_v41 = vpack.c.bf16 %v484_v23, %v483_v13  ;;  %v658_v43 = vpack.c.bf16 %v492_v24, %v491_v14  ;;  %v455_v46 = vadd.f32 %v895_v47, %v432_v25  ;;  %v463_v36 = vadd.f32 %v895_v47, %v440_v26  ;;  %v235_v44 = vpop.f32.mrb[7].mxu0  ;;  %v267_v48 = vpop.f32.mrb[7].mxu1 }
 0x101   :  { %v633_v50 = vpack.c.bf16 %v482_v29, %v481_v17  ;;  %v653_v51 = vpack.c.bf16 %v490_v30, %v489_v18  ;;  %v453_v35 = vadd.f32 %v895_v47, %v430_v31  ;;  %v461_v42 = vadd.f32 %v895_v47, %v438_v32 }
 0x102   :  { %670 = vst [vmem:[%s955_s4 + $0x8] sm:$0xff] %v638_v41   ;;  %674 = vst [vmem:[%s955_s4 + $0x28] sm:$0xff] %v658_v43   ;;  %v433_v52 = vmul.f32 %v716_v34, %v888_v40  ;;  %v441_v53 = vmul.f32 %v724_v33, %v424_v49  ;;  %v431_v54 = vmul.f32 %v884_v38, %v235_v44  ;;  %v471_v56 = vmax.f32 %v455_v46, 0.0 }
 0x103   :  { %634 = vst [vmem:[%s955_s4] sm:$0xff] %v633_v50   ;;  %673 = vst [vmem:[%s955_s4 + $0x20] sm:$0xff] %v653_v51   ;;  %v439_v55 = vmul.f32 %v903_v7, %v267_v48  ;;  %v479_v57 = vmax.f32 %v463_v36, 0.0  ;;  %v469_v60 = vmax.f32 %v453_v35, 0.0  ;;  %v477_v61 = vmax.f32 %v461_v42, 0.0 }
 0x104   :  { %v456_v58 = vadd.f32 %v895_v47, %v433_v52  ;;  %v464_v59 = vadd.f32 %v895_v47, %v441_v53  ;;  %v454_v62 = vadd.f32 %v895_v47, %v431_v54  ;;  %v487_v4 = vmul.f32 %v471_v56, %v886_v39 }
 0x105   :  { %v462_v63 = vadd.f32 %v895_v47, %v439_v55  ;;  %v495_v5 = vmul.f32 %v479_v57, %v419_v12  ;;  %v485_v9 = vmul.f32 %v469_v60, %v882_v37  ;;  %v493_v10 = vmul.f32 %v477_v61, %v890_v45 }
 0x106   :  { %v472_v0 = vmax.f32 %v456_v58, 0.0  ;;  %v480_v1 = vmax.f32 %v464_v59, 0.0  ;;  %v470_v2 = vmax.f32 %v454_v62, 0.0 }
 0x107   :  { %v478_v3 = vmax.f32 %v462_v63, 0.0 }
 0x108   :  { %v488_v6 = vmul.f32 %v472_v0, %v888_v40  ;;  %v496_v8 = vmul.f32 %v480_v1, %v424_v49  ;;  %v486_v11 = vmul.f32 %v470_v2, %v884_v38 }
 0x109   :  { %v494_v13 = vmul.f32 %v478_v3, %v903_v7 }
 0x10a   :  { %v648_v14 = vpack.c.bf16 %v488_v6, %v487_v4  ;;  %v668_v47 = vpack.c.bf16 %v496_v8, %v495_v5  ;;  %v643_v15 = vpack.c.bf16 %v486_v11, %v485_v9 }
 0x10b   :  { %v663_v16 = vpack.c.bf16 %v494_v13, %v493_v10 }
 0x10c   :  { %672 = vst [vmem:[%s955_s4 + $0x18] sm:$0xff] %v648_v14   ;;  %676 = vst [vmem:[%s955_s4 + $0x38] sm:$0xff] %v668_v47  }
 0x10d   :  { %671 = vst [vmem:[%s955_s4 + $0x10] sm:$0xff] %v643_v15   ;;  %675 = vst [vmem:[%s955_s4 + $0x30] sm:$0xff] %v663_v16  }

// kernel: gcae_forward.4
= control target key start
LH: loop header
LB: loop body
LE: loop exit
PB: predicated region body
PF: predicated region fallthrough
CT: control target
= control target key end

     0   :  { %v1577_v1 = vmov 0   ;;  %s1842_s1 = inlined_call_operand.vmem [shape: bf16[128,128], index: 1, kind: input, shape index: {}]   ;;  %s1843_s0 = inlined_call_operand.vmem [shape: bf16[128,128], index: 0, kind: input, shape index: {}]   ;;  %s1844_s2 = inlined_call_operand.vmem [shape: f32[128,1], index: 2, kind: input, shape index: {}]   ;;  %s1845_s3 = inlined_call_operand.vmem [shape: bf16[128,128], index: 3, kind: input, shape index: {}]   ;;  %s1846_s5 = inlined_call_operand.vmem [shape: bf16[128,128], index: 5, kind: input, shape index: {}]   ;;  %s1847_s6 = inlined_call_operand.vmem [shape: bf16[128,128], index: 6, kind: input, shape index: {}]   ;;  %s1848_s4 = inlined_call_operand.vmem [shape: f32[1,128], index: 4, kind: input, shape index: {}]   ;;  %s1849_s7 = inlined_call_operand.vmem [shape: bf16[128,128], index: 7, kind: output, shape index: {0}]   ;;  %s1850_s8 = inlined_call_operand.vmem [shape: bf16[128,128], index: 8, kind: output, shape index: {1}]  }
   0x1   :  { %v1537_v0 = vld [vmem:[%s1842_s1] sm:$0xff]   ;;  %1535 = vset.pattern.permute.xlu0 %v1577_v1  ;;  %1536 = vset.pattern.permute.xlu1 %v1577_v1  ;;  %v1538_v2 = vld [vmem:[%s1842_s1 + $0x8] sm:$0xff]   ;;  %v1539_v3 = vld [vmem:[%s1842_s1 + $0x10] sm:$0xff]  }
   0x2   :  { %1406 = vmatprep.subr.bf16.mxu0 %v1537_v0  ;;  %v1540_v4 = vld [vmem:[%s1842_s1 + $0x18] sm:$0xff]   ;;  %v1545_v5 = vld [vmem:[%s1843_s0] sm:$0xff]   ;;  %v1542_v7 = vld [vmem:[%s1842_s1 + $0x28] sm:$0xff]  }
   0x3   :  { %1407 = vmatpush3.bf16.msra.mxu0 %v1537_v0  ;;  %1422 = vmatprep.mubr.bf16.mxu0 %v1545_v5  ;;  %v1541_v6 = vld [vmem:[%s1842_s1 + $0x20] sm:$0xff]   ;;  %v327_v9 = vld [vmem:[%s1844_s2 + $0x10] sm:$0xff]  ;;  %v326_v10 = vld [vmem:[%s1844_s2 + $0x8] sm:$0xff] }
   0x4   :  { %1408 = vmatprep.subr.bf16.mxu0 %v1538_v2  ;;  %v325_v8 = vld [vmem:[%s1844_s2] sm:$0xff]  ;;  %369 = vperm.xlu1 %1536, %v327_v9   ;;  %v328_v11 = vld [vmem:[%s1844_s2 + $0x18] sm:$0xff]  ;;  %v1543_v12 = vld [vmem:[%s1842_s1 + $0x30] sm:$0xff]  }
   0x5   :  { %359 = vperm.xlu0 %1535, %v325_v8   ;;  %v329_v13 = vld [vmem:[%s1844_s2 + $0x20] sm:$0xff]  ;;  %v330_v14 = vld [vmem:[%s1844_s2 + $0x28] sm:$0xff]  ;;  %v1544_v15 = vld [vmem:[%s1842_s1 + $0x38] sm:$0xff]  }
   0x6   :  { %v1553_v16 = vld [vmem:[%s1845_s3] sm:$0xff]   ;;  %v331_v17 = vld [vmem:[%s1844_s2 + $0x30] sm:$0xff]  ;;  %v332_v18 = vld [vmem:[%s1844_s2 + $0x38] sm:$0xff] }
   0x7   :  { %1409 = vmatpush3.bf16.msra.mxu0 %v1538_v2  ;;  %1438 = vmatprep.subr.bf16.mxu1 %v1553_v16  ;;  %v1554_v19 = vld [vmem:[%s1845_s3 + $0x8] sm:$0xff]   ;;  %v1555_v20 = vld [vmem:[%s1845_s3 + $0x10] sm:$0xff]   ;;  %v333_v22 = vld [vmem:[%s1844_s2 + $0x40] sm:$0xff] }
   0x8   :  { %1410 = vmatprep.subr.bf16.mxu0 %v1539_v3  ;;  %374 = vperm.xlu1 %1536, %v328_v11   ;;  %v1546_v21 = vld [vmem:[%s1843_s0 + $0x8] sm:$0xff]   ;;  %v1547_v24 = vld [vmem:[%s1843_s0 + $0x10] sm:$0xff]   ;;  %v1556_v25 = vld [vmem:[%s1845_s3 + $0x18] sm:$0xff]  }
   0x9   :  { %364 = vperm.xlu0 %1535, %v326_v10   ;;  %1439 = vmatpush3.bf16.msra.mxu1 %v1553_v16  ;;  %v334_v23 = vld [vmem:[%s1844_s2 + $0x48] sm:$0xff]  ;;  %v335_v26 = vld [vmem:[%s1844_s2 + $0x50] sm:$0xff]  ;;  %v336_v27 = vld [vmem:[%s1844_s2 + $0x58] sm:$0xff] }
   0xa   :  { %1440 = vmatprep.subr.bf16.mxu1 %v1554_v19  ;;  %v1557_v28 = vld [vmem:[%s1845_s3 + $0x20] sm:$0xff]   ;;  %v1548_v29 = vld [vmem:[%s1843_s0 + $0x18] sm:$0xff]   ;;  %v338_v31 = vld [vmem:[%s1844_s2 + $0x68] sm:$0xff] }
   0xb   :  { %1411 = vmatpush3.bf16.msra.mxu0 %v1539_v3  ;;  %v337_v30 = vld [vmem:[%s1844_s2 + $0x60] sm:$0xff]  ;;  %v1558_v33 = vld [vmem:[%s1845_s3 + $0x28] sm:$0xff]   ;;  %v339_v34 = vld [vmem:[%s1844_s2 + $0x70] sm:$0xff] }
   0xc   :  { %1412 = vmatprep.subr.bf16.mxu0 %v1540_v4  ;;  %384 = vperm.xlu1 %1536, %v330_v14   ;;  %v1549_v32 = vld [vmem:[%s1843_s0 + $0x20] sm:$0xff]   ;;  %v340_v35 = vld [vmem:[%s1844_s2 + $0x78] sm:$0xff]  ;;  %v1550_v36 = vld [vmem:[%s1843_s0 + $0x28] sm:$0xff]  }
   0xd   :  { %379 = vperm.xlu0 %1535, %v329_v13   ;;  %1441 = vmatpush3.bf16.msra.mxu1 %v1554_v19  ;;  %v1551_v37 = vld [vmem:[%s1843_s0 + $0x30] sm:$0xff]   ;;  %v1552_v38 = vld [vmem:[%s1843_s0 + $0x38] sm:$0xff]   ;;  %v1561_v41 = vld [vmem:[%s1846_s5] sm:$0xff]  }
   0xe   :  { %1442 = vmatprep.subr.bf16.mxu1 %v1555_v20  ;;  %v1559_v39 = vld [vmem:[%s1845_s3 + $0x30] sm:$0xff]   ;;  %v1560_v40 = vld [vmem:[%s1845_s3 + $0x38] sm:$0xff]   ;;  %v1562_v42 = vld [vmem:[%s1846_s5 + $0x8] sm:$0xff]  }
   0xf   :  { %1413 = vmatpush3.bf16.msra.mxu0 %v1540_v4  ;;  %v1563_v43 = vld [vmem:[%s1846_s5 + $0x10] sm:$0xff]   ;;  %v1564_v44 = vld [vmem:[%s1846_s5 + $0x18] sm:$0xff]   ;;  %v1565_v45 = vld [vmem:[%s1846_s5 + $0x20] sm:$0xff]  }
  0x10   :  { %1414 = vmatprep.subr.bf16.mxu0 %v1541_v6  ;;  %394 = vperm.xlu1 %1536, %v332_v18   ;;  %v1566_v46 = vld [vmem:[%s1846_s5 + $0x28] sm:$0xff]  }
  0x11   :  { %389 = vperm.xlu0 %1535, %v331_v17   ;;  %1443 = vmatpush3.bf16.msra.mxu1 %v1555_v20 }
  0x12   :  { %1444 = vmatprep.subr.bf16.mxu1 %v1556_v25 }
  0x13   :  { %1415 = vmatpush3.bf16.msra.mxu0 %v1541_v6 }
  0x14   :  { %1416 = vmatprep.subr.bf16.mxu0 %v1542_v7  ;;  %404 = vperm.xlu1 %1536, %v334_v23  }
  0x15   :  { %399 = vperm.xlu0 %1535, %v333_v22   ;;  %1445 = vmatpush3.bf16.msra.mxu1 %v1556_v25 }
  0x16   :  { %1446 = vmatprep.subr.bf16.mxu1 %v1557_v28 }
  0x17   :  { %1417 = vmatpush3.bf16.msra.mxu0 %v1542_v7 }
  0x18   :  { %1418 = vmatprep.subr.bf16.mxu0 %v1543_v12  ;;  %414 = vperm.xlu1 %1536, %v336_v27  }
  0x19   :  { %409 = vperm.xlu0 %1535, %v335_v26   ;;  %1447 = vmatpush3.bf16.msra.mxu1 %v1557_v28 }
  0x1a   :  { %1448 = vmatprep.subr.bf16.mxu1 %v1558_v33 }
  0x1b   :  { %1419 = vmatpush3.bf16.msra.mxu0 %v1543_v12 }
  0x1c   :  { %1420 = vmatprep.subr.bf16.mxu0 %v1544_v15  ;;  %424 = vperm.xlu1 %1536, %v338_v31  }
  0x1d   :  { %419 = vperm.xlu0 %1535, %v337_v30   ;;  %1449 = vmatpush3.bf16.msra.mxu1 %v1558_v33 }
  0x1e   :  { %1450 = vmatprep.subr.bf16.mxu1 %v1559_v39 }
  0x1f   :  { %1421 = vmatpush3.bf16.msra.mxu0 %v1544_v15 }
  0x20   :  { %434 = vperm.xlu1 %1536, %v340_v35   ;;  %1470 = vmatprep.subr.bf16.mxu0 %v1561_v41 }
  0x21   :  { %429 = vperm.xlu0 %1535, %v339_v34   ;;  %1451 = vmatpush3.bf16.msra.mxu1 %v1559_v39  ;;  %v1567_v39 = vld [vmem:[%s1846_s5 + $0x30] sm:$0xff]  }
  0x22   :  { %1423 = vmatmul.mubr.bf16.vlgmr.msra.gmra.mrb[0].mxu0 %v1546_v21  ;;  %1452 = vmatprep.subr.bf16.mxu1 %v1560_v40 }
  0x23   :  { %1426 = vmatprep.mubr.bf16.mxu0 %v1547_v24  ;;  %1471 = vmatpush3.bf16.msra.mxu0 %v1561_v41  ;;  %v1569_v41 = vld [vmem:[%s1847_s6] sm:$0xff]  }
  0x24   :  { %1472 = vmatprep.subr.bf16.mxu0 %v1562_v42 }
  0x25   :  { %1453 = vmatpush3.bf16.msra.mxu1 %v1560_v40  ;;  %v1568_v40 = vld [vmem:[%s1846_s5 + $0x38] sm:$0xff]  }
  0x26   :  { %1502 = vmatprep.subr.bf16.mxu1 %v1569_v41 }
  0x27   :  { %1473 = vmatpush3.bf16.msra.mxu0 %v1562_v42  ;;  %v1570_v42 = vld [vmem:[%s1847_s6 + $0x8] sm:$0xff]  }
  0x28   :  { %1474 = vmatprep.subr.bf16.mxu0 %v1563_v43 }
  0x2a   :  { %1427 = vmatmul.mubr.bf16.gmra.mrb[4].mxu0 %v1548_v29 }
  0x2b   :  { %1430 = vmatprep.mubr.bf16.mxu0 %v1549_v32  ;;  %1475 = vmatpush3.bf16.msra.mxu0 %v1563_v43  ;;  %v1571_v43 = vld [vmem:[%s1847_s6 + $0x10] sm:$0xff]  }
  0x2c   :  { %1476 = vmatprep.subr.bf16.mxu0 %v1564_v44 }
  0x2f   :  { %1477 = vmatpush3.bf16.msra.mxu0 %v1564_v44  ;;  %v1572_v44 = vld [vmem:[%s1847_s6 + $0x18] sm:$0xff]  }
  0x30   :  { %1478 = vmatprep.subr.bf16.mxu0 %v1565_v45 }
  0x32   :  { %1431 = vmatmul.mubr.bf16.gmra.mrb[8].mxu0 %v1550_v36 }
  0x33   :  { %1434 = vmatprep.mubr.bf16.mxu0 %v1551_v37  ;;  %1479 = vmatpush3.bf16.msra.mxu0 %v1565_v45  ;;  %v1573_v45 = vld [vmem:[%s1847_s6 + $0x20] sm:$0xff]  }
  0x34   :  { %1480 = vmatprep.subr.bf16.mxu0 %v1566_v46 }
  0x37   :  { %1481 = vmatpush3.bf16.msra.mxu0 %v1566_v46  ;;  %v1574_v46 = vld [vmem:[%s1847_s6 + $0x28] sm:$0xff]  }
  0x38   :  { %1482 = vmatprep.subr.bf16.mxu0 %v1567_v39 }
  0x3a   :  { %1435 = vmatmul.mubr.bf16.gmra.mrb[12].mxu0 %v1552_v38 }
  0x3b   :  { %1483 = vmatpush3.bf16.msra.mxu0 %v1567_v39 }
  0x3c   :  { %1484 = vmatprep.subr.bf16.mxu0 %v1568_v40 }
  0x3f   :  { %1485 = vmatpush3.bf16.msra.mxu0 %v1568_v40 }
  0x83   :  { %v370_v48 = vpop.permute.xlu1 %369 }
  0x84   :  { %v360_v47 = vpop.permute.xlu0 %359 }
  0x87   :  { %v375_v50 = vpop.permute.xlu1 %374 }
  0x88   :  { %v365_v49 = vpop.permute.xlu0 %364 }
  0x8b   :  { %v385_v52 = vpop.permute.xlu1 %384 }
  0x8c   :  { %v380_v51 = vpop.permute.xlu0 %379 }
  0x8f   :  { %v395_v56 = vpop.permute.xlu1 %394 }
  0x90   :  { %v390_v54 = vpop.permute.xlu0 %389 }
  0x93   :  { %v405_v2 = vpop.permute.xlu1 %404 }
  0x94   :  { %v400_v1 = vpop.permute.xlu0 %399 }
  0x97   :  { %v415_v13 = vpop.permute.xlu1 %414 }
  0x98   :  { %v410_v11 = vpop.permute.xlu0 %409 }
  0x9b   :  { %v425_v22 = vpop.permute.xlu1 %424 }
  0x9c   :  { %v420_v18 = vpop.permute.xlu0 %419 }
  0x9f   :  { %v435_v30 = vpop.permute.xlu1 %434 }
  0xa0   :  { %v430_v28 = vpop.permute.xlu0 %429 }
  0xf5   :  { %v1424_v53 = vpop.f32.mrb[0].mxu0 }
  0xf6   :  { %v227_v55 = vpop.f32.mrb[1].mxu0  ;;  %v439_v58 = vmul.f32 %v1424_v53, %v370_v48  ;;  %v1159_v48 = vld [vmem:[%s1848_s4] ss:$0 sm:$0xff] }
  0xf7   :  { %v1425_v57 = vpop.f32.mrb[2].mxu0  ;;  %v437_v61 = vmul.f32 %v360_v47, %v227_v55 }
  0xf8   :  { %v440_v59 = vmul.f32 %v1425_v57, %v375_v50  ;;  %v230_v60 = vpop.f32.mrb[3].mxu0 }
  0xf9   :  { %v438_v62 = vmul.f32 %v365_v49, %v230_v60 }
  0xfa   :  { %v454_v63 = vpack.c.bf16 %v440_v59, %v439_v58 }
  0xfb   :  { %v453_v0 = vpack.c.bf16 %v438_v62, %v437_v61 }
  0xfd   :  { %v1428_v3 = vpop.f32.mrb[4].mxu0  ;;  %1454 = vmatprep.mubr.bf16.mxu1 %v453_v0 }
  0xfe   :  { %v243_v4 = vpop.f32.mrb[5].mxu0  ;;  %1455 = vmatmul.mubr.bf16.vlgmr.msra.gmra.mrb[0].mxu1 %v454_v63  ;;  %v443_v6 = vmul.f32 %v1428_v3, %v390_v54 }
  0xff   :  { %v1429_v5 = vpop.f32.mrb[6].mxu0  ;;  %v441_v9 = vmul.f32 %v380_v51, %v243_v4  ;;  %1503 = vmatpush3.bf16.msra.mxu1 %v1569_v41 }
 0x100   :  { %v444_v7 = vmul.f32 %v1429_v5, %v395_v56  ;;  %v246_v8 = vpop.f32.mrb[7].mxu0  ;;  %1504 = vmatprep.subr.bf16.mxu1 %v1570_v42 }
 0x101   :  { %v442_v10 = vmul.f32 %v385_v52, %v246_v8 }
 0x102   :  { %v456_v12 = vpack.c.bf16 %v444_v7, %v443_v6 }
 0x103   :  { %v455_v14 = vpack.c.bf16 %v442_v10, %v441_v9  ;;  %1505 = vmatpush3.bf16.msra.mxu1 %v1570_v42 }
 0x104   :  { %1506 = vmatprep.subr.bf16.mxu1 %v1571_v43 }
 0x105   :  { %v1432_v15 = vpop.f32.mrb[8].mxu0  ;;  %1458 = vmatprep.mubr.bf16.mxu1 %v455_v14 }
 0x106   :  { %v259_v16 = vpop.f32.mrb[9].mxu0  ;;  %1459 = vmatmul.mubr.bf16.gmra.mrb[4].mxu1 %v456_v12  ;;  %v447_v19 = vmul.f32 %v1432_v15, %v410_v11 }
 0x107   :  { %v1433_v17 = vpop.f32.mrb[10].mxu0  ;;  %v445_v23 = vmul.f32 %v400_v1, %v259_v16  ;;  %1507 = vmatpush3.bf16.msra.mxu1 %v1571_v43 }
 0x108   :  { %v448_v20 = vmul.f32 %v1433_v17, %v415_v13  ;;  %v262_v21 = vpop.f32.mrb[11].mxu0  ;;  %1508 = vmatprep.subr.bf16.mxu1 %v1572_v44 }
 0x109   :  { %v446_v24 = vmul.f32 %v405_v2, %v262_v21 }
 0x10a   :  { %v458_v25 = vpack.c.bf16 %v448_v20, %v447_v19 }
 0x10b   :  { %v457_v26 = vpack.c.bf16 %v446_v24, %v445_v23  ;;  %1509 = vmatpush3.bf16.msra.mxu1 %v1572_v44  ;;  %v1575_v24 = vld [vmem:[%s1847_s6 + $0x30] sm:$0xff]  }
 0x10c   :  { %1510 = vmatprep.subr.bf16.mxu1 %v1573_v45 }
 0x10d   :  { %v1436_v27 = vpop.f32.mrb[12].mxu0  ;;  %1462 = vmatprep.mubr.bf16.mxu1 %v457_v26 }
 0x10e   :  { %v275_v29 = vpop.f32.mrb[13].mxu0  ;;  %1463 = vmatmul.mubr.bf16.gmra.mrb[8].mxu1 %v458_v25  ;;  %v451_v32 = vmul.f32 %v1436_v27, %v430_v28  ;;  %v1576_v25 = vld [vmem:[%s1847_s6 + $0x38] sm:$0xff]  }
 0x10f   :  { %v1437_v31 = vpop.f32.mrb[14].mxu0  ;;  %v449_v35 = vmul.f32 %v420_v18, %v275_v29  ;;  %1511 = vmatpush3.bf16.msra.mxu1 %v1573_v45 }
 0x110   :  { %v452_v33 = vmul.f32 %v1437_v31, %v435_v30  ;;  %v278_v34 = vpop.f32.mrb[15].mxu0  ;;  %1512 = vmatprep.subr.bf16.mxu1 %v1574_v46 }
 0x111   :  { %v450_v36 = vmul.f32 %v425_v22, %v278_v34 }
 0x112   :  { %v460_v37 = vpack.c.bf16 %v452_v33, %v451_v32 }
 0x113   :  { %v459_v38 = vpack.c.bf16 %v450_v36, %v449_v35  ;;  %1513 = vmatpush3.bf16.msra.mxu1 %v1574_v46 }
 0x114   :  { %1514 = vmatprep.subr.bf16.mxu1 %v1575_v24 }
 0x115   :  { %1466 = vmatprep.mubr.bf16.mxu1 %v459_v38 }
 0x116   :  { %1467 = vmatmul.mubr.bf16.gmra.mrb[12].mxu1 %v460_v37 }
 0x117   :  { %1515 = vmatpush3.bf16.msra.mxu1 %v1575_v24 }
 0x118   :  { %1516 = vmatprep.subr.bf16.mxu1 %v1576_v25 }
 0x11b   :  { %1517 = vmatpush3.bf16.msra.mxu1 %v1576_v25 }
 0x1d1   :  { %v1456_v47 = vpop.f32.mrb[0].mxu1 }
 0x1d2   :  { %v566_v49 = vpop.f32.mrb[1].mxu1  ;;  %v575_v51 = vadd.f32 %v1456_v47, %v1159_v48 }
 0x1d3   :  { %v1457_v50 = vpop.f32.mrb[2].mxu1  ;;  %v567_v54 = vadd.f32 %v1159_v48, %v566_v49 }
 0x1d4   :  { %v578_v52 = vadd.f32 %v1457_v50, %v1159_v48  ;;  %v569_v53 = vpop.f32.mrb[3].mxu1 }
 0x1d5   :  { %v570_v55 = vadd.f32 %v1159_v48, %v569_v53 }
 0x1d6   :  { %v630_v56 = vpack.c.bf16 %v578_v52, %v575_v51 }
 0x1d7   :  { %v629_v57 = vpack.c.bf16 %v570_v55, %v567_v54 }
 0x1d8   :  { %1328 = vst [vmem:[%s1849_s7 + $0x8] sm:$0xff] %v630_v56  }
 0x1d9   :  { %1252 = vst [vmem:[%s1849_s7] sm:$0xff] %v629_v57   ;;  %v1460_v58 = vpop.f32.mrb[4].mxu1  ;;  %1486 = vmatprep.mubr.bf16.mxu0 %v629_v57 }
 0x1da   :  { %v582_v59 = vpop.f32.mrb[5].mxu1  ;;  %1487 = vmatmul.mubr.bf16.vlgmr.msra.gmra.mrb[16].mxu0 %v630_v56  ;;  %v591_v61 = vadd.f32 %v1460_v58, %v1159_v48 }
 0x1db   :  { %v1461_v60 = vpop.f32.mrb[6].mxu1  ;;  %v583_v0 = vadd.f32 %v1159_v48, %v582_v59 }
 0x1dc   :  { %v594_v62 = vadd.f32 %v1461_v60, %v1159_v48  ;;  %v585_v63 = vpop.f32.mrb[7].mxu1 }
 0x1dd   :  { %v586_v1 = vadd.f32 %v1159_v48, %v585_v63 }
 0x1de   :  { %v632_v2 = vpack.c.bf16 %v594_v62, %v591_v61 }
 0x1df   :  { %v631_v3 = vpack.c.bf16 %v586_v1, %v583_v0 }
 0x1e0   :  { %1330 = vst [vmem:[%s1849_s7 + $0x18] sm:$0xff] %v632_v2  }
 0x1e1   :  { %1329 = vst [vmem:[%s1849_s7 + $0x10] sm:$0xff] %v631_v3   ;;  %v1464_v4 = vpop.f32.mrb[8].mxu1  ;;  %1490 = vmatprep.mubr.bf16.mxu0 %v631_v3 }
 0x1e2   :  { %v598_v5 = vpop.f32.mrb[9].mxu1  ;;  %1491 = vmatmul.mubr.bf16.gmra.mrb[20].mxu0 %v632_v2  ;;  %v607_v7 = vadd.f32 %v1464_v4, %v1159_v48 }
 0x1e3   :  { %v1465_v6 = vpop.f32.mrb[10].mxu1  ;;  %v599_v10 = vadd.f32 %v1159_v48, %v598_v5 }
 0x1e4   :  { %v610_v8 = vadd.f32 %v1465_v6, %v1159_v48  ;;  %v601_v9 = vpop.f32.mrb[11].mxu1 }
 0x1e5   :  { %v602_v11 = vadd.f32 %v1159_v48, %v601_v9 }
 0x1e6   :  { %v634_v12 = vpack.c.bf16 %v610_v8, %v607_v7 }
 0x1e7   :  { %v633_v13 = vpack.c.bf16 %v602_v11, %v599_v10 }
 0x1e8   :  { %1332 = vst [vmem:[%s1849_s7 + $0x28] sm:$0xff] %v634_v12  }
 0x1e9   :  { %1331 = vst [vmem:[%s1849_s7 + $0x20] sm:$0xff] %v633_v13   ;;  %v1468_v14 = vpop.f32.mrb[12].mxu1  ;;  %1494 = vmatprep.mubr.bf16.mxu0 %v633_v13 }
 0x1ea   :  { %v614_v15 = vpop.f32.mrb[13].mxu1  ;;  %1495 = vmatmul.mubr.bf16.gmra.mrb[24].mxu0 %v634_v12  ;;  %v623_v17 = vadd.f32 %v1468_v14, %v1159_v48 }
 0x1eb   :  { %v1469_v16 = vpop.f32.mrb[14].mxu1  ;;  %v615_v20 = vadd.f32 %v1159_v48, %v614_v15 }
 0x1ec   :  { %v626_v18 = vadd.f32 %v1469_v16, %v1159_v48  ;;  %v617_v19 = vpop.f32.mrb[15].mxu1 }
 0x1ed   :  { %v618_v21 = vadd.f32 %v1159_v48, %v617_v19 }
 0x1ee   :  { %v636_v22 = vpack.c.bf16 %v626_v18, %v623_v17 }
 0x1ef   :  { %v635_v23 = vpack.c.bf16 %v618_v21, %v615_v20 }
 0x1f0   :  { %1334 = vst [vmem:[%s1849_s7 + $0x38] sm:$0xff] %v636_v22  }
 0x1f1   :  { %1333 = vst [vmem:[%s1849_s7 + $0x30] sm:$0xff] %v635_v23   ;;  %1498 = vmatprep.mubr.bf16.mxu0 %v635_v23 }
 0x1f2   :  { %1499 = vmatmul.mubr.bf16.gmra.mrb[28].mxu0 %v636_v22 }
 0x2ad   :  { %v1488_v26 = vpop.f32.mrb[16].mxu0 }
 0x2ae   :  { %v807_v27 = vpop.f32.mrb[17].mxu0  ;;  %v872_v29 = vmax.f32 %v1488_v26, 0.0 }
 0x2af   :  { %v1489_v28 = vpop.f32.mrb[18].mxu0  ;;  %v870_v32 = vmax.f32 %v807_v27, 0.0 }
 0x2b0   :  { %v873_v30 = vmax.f32 %v1489_v28, 0.0  ;;  %v810_v31 = vpop.f32.mrb[19].mxu0 }
 0x2b1   :  { %v871_v33 = vmax.f32 %v810_v31, 0.0 }
 0x2b2   :  { %v887_v34 = vpack.c.bf16 %v873_v30, %v872_v29 }
 0x2b3   :  { %v886_v35 = vpack.c.bf16 %v871_v33, %v870_v32 }
 0x2b5   :  { %v1492_v36 = vpop.f32.mrb[20].mxu0  ;;  %1518 = vmatprep.mubr.bf16.mxu1 %v886_v35 }
 0x2b6   :  { %v823_v37 = vpop.f32.mrb[21].mxu0  ;;  %1519 = vmatmul.mubr.bf16.vlgmr.msra.gmra.mrb[16].mxu1 %v887_v34  ;;  %v876_v39 = vmax.f32 %v1492_v36, 0.0 }
 0x2b7   :  { %v1493_v38 = vpop.f32.mrb[22].mxu0  ;;  %v874_v42 = vmax.f32 %v823_v37, 0.0 }
 0x2b8   :  { %v877_v40 = vmax.f32 %v1493_v38, 0.0  ;;  %v826_v41 = vpop.f32.mrb[23].mxu0 }
 0x2b9   :  { %v875_v43 = vmax.f32 %v826_v41, 0.0 }
 0x2ba   :  { %v889_v44 = vpack.c.bf16 %v877_v40, %v876_v39 }
 0x2bb   :  { %v888_v45 = vpack.c.bf16 %v875_v43, %v874_v42 }
 0x2bd   :  { %v1496_v46 = vpop.f32.mrb[24].mxu0  ;;  %1522 = vmatprep.mubr.bf16.mxu1 %v888_v45 }
 0x2be   :  { %v839_v47 = vpop.f32.mrb[25].mxu0  ;;  %1523 = vmatmul.mubr.bf16.gmra.mrb[20].mxu1 %v889_v44  ;;  %v880_v49 = vmax.f32 %v1496_v46, 0.0 }
 0x2bf   :  { %v1497_v48 = vpop.f32.mrb[26].mxu0  ;;  %v878_v52 = vmax.f32 %v839_v47, 0.0 }
 0x2c0   :  { %v881_v50 = vmax.f32 %v1497_v48, 0.0  ;;  %v842_v51 = vpop.f32.mrb[27].mxu0 }
 0x2c1   :  { %v879_v53 = vmax.f32 %v842_v51, 0.0 }
 0x2c2   :  { %v891_v54 = vpack.c.bf16 %v881_v50, %v880_v49 }
 0x2c3   :  { %v890_v55 = vpack.c.bf16 %v879_v53, %v878_v52 }
 0x2c5   :  { %v1500_v56 = vpop.f32.mrb[28].mxu0  ;;  %1526 = vmatprep.mubr.bf16.mxu1 %v890_v55 }
 0x2c6   :  { %v855_v57 = vpop.f32.mrb[29].mxu0  ;;  %1527 = vmatmul.mubr.bf16.gmra.mrb[24].mxu1 %v891_v54  ;;  %v884_v59 = vmax.f32 %v1500_v56, 0.0 }
 0x2c7   :  { %v1501_v58 = vpop.f32.mrb[30].mxu0  ;;  %v882_v62 = vmax.f32 %v855_v57, 0.0 }
 0x2c8   :  { %v885_v60 = vmax.f32 %v1501_v58, 0.0  ;;  %v858_v61 = vpop.f32.mrb[31].mxu0 }
 0x2c9   :  { %v883_v63 = vmax.f32 %v858_v61, 0.0 }
 0x2ca   :  { %v893_v0 = vpack.c.bf16 %v885_v60, %v884_v59 }
 0x2cb   :  { %v892_v1 = vpack.c.bf16 %v883_v63, %v882_v62 }
 0x2cd   :  { %1530 = vmatprep.mubr.bf16.mxu1 %v892_v1 }
 0x2ce   :  { %1531 = vmatmul.mubr.bf16.gmra.mrb[28].mxu1 %v893_v0 }
 0x389   :  { %v1520_v2 = vpop.f32.mrb[16].mxu1 }
 0x38a   :  { %v992_v3 = vpop.f32.mrb[17].mxu1 }
 0x38b   :  { %v1521_v4 = vpop.f32.mrb[18].mxu1 }
 0x38c   :  { %v1296_v5 = vpack.c.bf16 %v1521_v4, %v1520_v2  ;;  %v995_v6 = vpop.f32.mrb[19].mxu1 }
 0x38d   :  { %v1291_v7 = vpack.c.bf16 %v995_v6, %v992_v3 }
 0x38e   :  { %1335 = vst [vmem:[%s1850_s8 + $0x8] sm:$0xff] %v1296_v5  }
 0x38f   :  { %1292 = vst [vmem:[%s1850_s8] sm:$0xff] %v1291_v7  }
 0x391   :  { %v1524_v8 = vpop.f32.mrb[20].mxu1 }
 0x392   :  { %v1008_v9 = vpop.f32.mrb[21].mxu1 }
 0x393   :  { %v1525_v10 = vpop.f32.mrb[22].mxu1 }
 0x394   :  { %v1306_v11 = vpack.c.bf16 %v1525_v10, %v1524_v8  ;;  %v1011_v12 = vpop.f32.mrb[23].mxu1 }
 0x395   :  { %v1301_v13 = vpack.c.bf16 %v1011_v12, %v1008_v9 }
 0x396   :  { %1337 = vst [vmem:[%s1850_s8 + $0x18] sm:$0xff] %v1306_v11  }
 0x397   :  { %1336 = vst [vmem:[%s1850_s8 + $0x10] sm:$0xff] %v1301_v13  }
 0x399   :  { %v1528_v14 = vpop.f32.mrb[24].mxu1 }
 0x39a   :  { %v1024_v15 = vpop.f32.mrb[25].mxu1 }
 0x39b   :  { %v1529_v16 = vpop.f32.mrb[26].mxu1 }
 0x39c   :  { %v1316_v17 = vpack.c.bf16 %v1529_v16, %v1528_v14  ;;  %v1027_v18 = vpop.f32.mrb[27].mxu1 }
 0x39d   :  { %v1311_v19 = vpack.c.bf16 %v1027_v18, %v1024_v15 }
 0x39e   :  { %1339 = vst [vmem:[%s1850_s8 + $0x28] sm:$0xff] %v1316_v17  }
 0x39f   :  { %1338 = vst [vmem:[%s1850_s8 + $0x20] sm:$0xff] %v1311_v19  }
 0x3a1   :  { %v1532_v20 = vpop.f32.mrb[28].mxu1 }
 0x3a2   :  { %v1040_v21 = vpop.f32.mrb[29].mxu1 }
 0x3a3   :  { %v1533_v22 = vpop.f32.mrb[30].mxu1 }
 0x3a4   :  { %v1326_v23 = vpack.c.bf16 %v1533_v22, %v1532_v20  ;;  %v1043_v24 = vpop.f32.mrb[31].mxu1 }
 0x3a5   :  { %v1321_v25 = vpack.c.bf16 %v1043_v24, %v1040_v21 }
 0x3a6   :  { %1341 = vst [vmem:[%s1850_s8 + $0x38] sm:$0xff] %v1326_v23  }
 0x3a7   :  { %1340 = vst [vmem:[%s1850_s8 + $0x30] sm:$0xff] %v1321_v25  }

</bundles_post_ra>
